<compile_context>
chip_gen: v7x
topology: tpu7x:2x2x1
jax: 0.10.0
libtpu: 0.0.40
codegen_flags: <defaults>
</compile_context>

<pallas_src>
import functools

import jax
import jax.numpy as jnp
from jax.experimental import pallas as pl
from jax.experimental.pallas import tpu as pltpu


# ----------------------------------------------------------------------------
# Fused single-step kernel: conv (as one im2col matmul) + ReLU + GAP for both
# siamese branches, then the 3-layer MLP classifier.
# ----------------------------------------------------------------------------
def fused_ncnv2_kernel(patches_ref, wc_ref, bc_ref,
                       w1l_ref, w1r_ref, b1_ref,
                       w2_ref, b2_ref, w3_ref, b3_ref,
                       out_ref, *, batch, hw):
    """
    patches_ref: [2B*HW, 9*C_in]  bf16 im2col patches (left images then right)
    wc_ref     : [9*C_in, C_feat] conv weights, tap-major / channel-minor (bf16)
    bc_ref     : [1, C_feat]      conv bias (f32)
    w1l/w1r    : [C_feat, 128]    top / bottom halves of Linear1 (bf16)
    w2_ref     : [128, 64]   w3_ref: [64, 128] (zero-padded to 128 lanes)  (bf16)
    b*_ref     : [1, N] f32 biases
    out_ref    : [B, 128]         padded logits
    """
    # ---- backbone conv: ONE K=9*C_in MXU matmul over all 2B images (M=2B*HW)
    acc = jnp.dot(patches_ref[...], wc_ref[...],
                  preferred_element_type=jnp.float32)        # [2B*HW, C_feat] f32
    act = jnp.maximum(acc + bc_ref[...], 0.0)

    # ---- global average pool: per-image sublane-band sums (VPU/XLU, not MXU)
    inv_hw = 1.0 / hw
    left_rows = [jnp.sum(act[b * hw:(b + 1) * hw, :], axis=0, keepdims=True)
                 for b in range(batch)]
    right_rows = [jnp.sum(act[(batch + b) * hw:(batch + b + 1) * hw, :],
                          axis=0, keepdims=True)
                  for b in range(batch)]
    f_left = (jnp.concatenate(left_rows, axis=0) * inv_hw).astype(jnp.bfloat16)
    f_right = (jnp.concatenate(right_rows, axis=0) * inv_hw).astype(jnp.bfloat16)

    # ---- classifier (Dropout == identity at inference)
    # concat(f_left, f_right) @ W1 == f_left @ W1_top + f_right @ W1_bot
    h1 = jnp.maximum(
        jnp.dot(f_left, w1l_ref[...], preferred_element_type=jnp.float32)
        + jnp.dot(f_right, w1r_ref[...], preferred_element_type=jnp.float32)
        + b1_ref[...], 0.0)
    # TODO(synk): train-mode Dropout(p=0.5) would use pltpu.prng_seed /
    # pltpu.prng_random_bits; eval()-mode identity is implemented here.
    h2 = jnp.maximum(
        jnp.dot(h1.astype(jnp.bfloat16), w2_ref[...],
                preferred_element_type=jnp.float32) + b2_ref[...], 0.0)
    out_ref[...] = (jnp.dot(h2.astype(jnp.bfloat16), w3_ref[...],
                            preferred_element_type=jnp.float32) + b3_ref[...])


# ----------------------------------------------------------------------------
# Wrapper: layout glue (im2col, weight reshapes, lane padding) + one pallas_call
# ----------------------------------------------------------------------------
@jax.jit
def ncnv2_forward(x_left, x_right, params):
    B, C, H, W = x_left.shape
    C_feat = params["conv_w"].shape[0]
    OUT = params["w3"].shape[1]
    LANE = 128
    HW = H * W

    # Stack left/right along batch, NCHW -> NHWC, spatial pad=1 ("SAME" conv).
    x = jnp.concatenate([x_left, x_right], axis=0)                 # [2B, C, H, W]
    xp = jnp.pad(jnp.transpose(x, (0, 2, 3, 1)),
                 ((0, 0), (1, 1), (1, 1), (0, 0)))                 # [2B, H+2, W+2, C]
    # im2col in the wrapper (tiny here): tap-major, channel-minor -> [2B*HW, 9*C]
    patches = jnp.concatenate(
        [xp[:, dy:dy + H, dx:dx + W, :] for dy in range(3) for dx in range(3)],
        axis=-1)
    patches = patches.reshape(2 * B * HW, 9 * C).astype(jnp.bfloat16)

    # Conv weight [C_feat, C, 3, 3] -> [9*C, C_feat] (same tap/channel order).
    wc = jnp.transpose(params["conv_w"], (2, 3, 1, 0)).reshape(9 * C, C_feat)
    wc = wc.astype(jnp.bfloat16)
    bc = params["conv_b"].reshape(1, C_feat).astype(jnp.float32)

    w1 = params["w1"].astype(jnp.bfloat16)                         # [2*C_feat, 128]
    w1l, w1r = w1[:C_feat], w1[C_feat:]
    b1 = params["b1"].reshape(1, -1).astype(jnp.float32)
    w2 = params["w2"].astype(jnp.bfloat16)                         # [128, 64]
    b2 = params["b2"].reshape(1, -1).astype(jnp.float32)
    # Pad the last Linear to 128 output lanes -> lane-dense store; slice after.
    w3 = jnp.zeros((params["w3"].shape[0], LANE), jnp.bfloat16)
    w3 = w3.at[:, :OUT].set(params["w3"].astype(jnp.bfloat16))
    b3 = jnp.zeros((1, LANE), jnp.float32).at[:, :OUT].set(params["b3"])

    vmem = pl.BlockSpec(memory_space=pltpu.MemorySpace.VMEM)
    kern = functools.partial(fused_ncnv2_kernel, batch=B, hw=HW)
    out_padded = pl.pallas_call(
        kern,
        out_shape=jax.ShapeDtypeStruct((B, LANE), jnp.float32),
        in_specs=[vmem] * 10,
        out_specs=vmem,
    )(patches, wc, bc, w1l, w1r, b1, w2, b2, w3, b3)
    return out_padded[:, :OUT]


# ----------------------------------------------------------------------------
# Pure-JAX f32 reference for correctness checking
# ----------------------------------------------------------------------------
def ncnv2_reference(x_left, x_right, params):
    def backbone(x):
        y = jax.lax.conv_general_dilated(
            x, params["conv_w"], window_strides=(1, 1), padding="SAME",
            dimension_numbers=("NCHW", "OIHW", "NCHW"))
        y = jnp.maximum(y + params["conv_b"][None, :, None, None], 0.0)
        return y.mean(axis=(2, 3))
    h = jnp.concatenate([backbone(x_left), backbone(x_right)], axis=1)
    h = jnp.maximum(h @ params["w1"] + params["b1"], 0.0)
    h = jnp.maximum(h @ params["w2"] + params["b2"], 0.0)
    return h @ params["w3"] + params["b3"]


if __name__ == "__main__":
    B, C_in, H, W = 2, 4, 16, 16        # x_left / x_right: [2, 4, 16, 16]
    C_feat = 16                          # backbone feature dim == classifier_in_shape
    OUT = 10                             # classifier_out_shape

    key = jax.random.PRNGKey(0)
    ks = jax.random.split(key, 10)

    params = {
        "conv_w": 0.1 * jax.random.normal(ks[0], (C_feat, C_in, 3, 3), jnp.float32),
        "conv_b": 0.1 * jax.random.normal(ks[1], (C_feat,), jnp.float32),
        "w1": 0.1 * jax.random.normal(ks[2], (2 * C_feat, 128), jnp.float32),
        "b1": 0.1 * jax.random.normal(ks[3], (128,), jnp.float32),
        "w2": 0.1 * jax.random.normal(ks[4], (128, 64), jnp.float32),
        "b2": 0.1 * jax.random.normal(ks[5], (64,), jnp.float32),
        "w3": 0.1 * jax.random.normal(ks[6], (64, OUT), jnp.float32),
        "b3": 0.1 * jax.random.normal(ks[7], (OUT,), jnp.float32),
    }

    x_left = jax.random.normal(ks[8], (B, C_in, H, W), jnp.float32)
    x_right = jax.random.normal(ks[9], (B, C_in, H, W), jnp.float32)

    out = jax.block_until_ready(ncnv2_forward(x_left, x_right, params))
    ref = jax.block_until_ready(ncnv2_reference(x_left, x_right, params))

    assert out.shape == (B, OUT), out.shape
    # bf16 matmul operands (f32 accumulation) vs. an all-f32 reference.
    err = float(jnp.max(jnp.abs(out - ref)))
    assert jnp.allclose(out, ref, atol=3e-2, rtol=3e-2), err
    print("KERNEL_OK")
</pallas_src>

<mosaic_0001>
module attributes {stable_mosaic.version = 11 : i64} {
  func.func @fused_ncnv2_kernel(%arg0: memref<1024x36xbf16, #tpu.memory_space<vmem>>, %arg1: memref<36x16xbf16, #tpu.memory_space<vmem>>, %arg2: memref<1x16xf32, #tpu.memory_space<vmem>>, %arg3: memref<16x128xbf16, #tpu.memory_space<vmem>>, %arg4: memref<16x128xbf16, #tpu.memory_space<vmem>>, %arg5: memref<1x128xf32, #tpu.memory_space<vmem>>, %arg6: memref<128x64xbf16, #tpu.memory_space<vmem>>, %arg7: memref<1x64xf32, #tpu.memory_space<vmem>>, %arg8: memref<64x128xbf16, #tpu.memory_space<vmem>>, %arg9: memref<1x128xf32, #tpu.memory_space<vmem>>, %arg10: memref<2x128xf32, #tpu.memory_space<vmem>>) attributes {dimension_semantics = [], scalar_prefetch = 0 : i64, scratch_operands = 0 : i64, tpu.core_type = #tpu.core_type<tc>} {
    %c0 = arith.constant 0 : index
    %c0_0 = arith.constant 0 : index
    %0 = vector.load %arg0[%c0, %c0_0] : memref<1024x36xbf16, #tpu.memory_space<vmem>>, vector<1024x36xbf16>
    %c0_1 = arith.constant 0 : index
    %c0_2 = arith.constant 0 : index
    %1 = vector.load %arg1[%c0_1, %c0_2] : memref<36x16xbf16, #tpu.memory_space<vmem>>, vector<36x16xbf16>
    %cst = arith.constant dense<0.000000e+00> : vector<1024x16xf32>
    %2 = tpu.matmul %0, %1, %cst {dimension_numbers = #tpu.dot_dimension_numbers<[1], [0], [0], [1], [0, 0, 1, 1], [], []>} : vector<1024x36xbf16>, vector<36x16xbf16>, vector<1024x16xf32> -> vector<1024x16xf32>
    %c0_3 = arith.constant 0 : index
    %c0_4 = arith.constant 0 : index
    %3 = vector.load %arg2[%c0_3, %c0_4] : memref<1x16xf32, #tpu.memory_space<vmem>>, vector<1x16xf32>
    %4 = vector.broadcast %3 : vector<1x16xf32> to vector<1024x16xf32>
    %5 = arith.addf %2, %4 : vector<1024x16xf32>
    %cst_5 = arith.constant 0.000000e+00 : f32
    %6 = vector.broadcast %cst_5 : f32 to vector<1024x16xf32>
    %7 = arith.maximumf %5, %6 : vector<1024x16xf32>
    %8 = vector.extract_strided_slice %7 {offsets = [0, 0], sizes = [256, 16], strides = [1, 1]} : vector<1024x16xf32> to vector<256x16xf32>
    %cst_6 = arith.constant dense<0.000000e+00> : vector<16xf32>
    %9 = vector.multi_reduction <add>, %8, %cst_6 [0] : vector<256x16xf32> to vector<16xf32>
    %10 = vector.shape_cast %9 : vector<16xf32> to vector<1x16xf32>
    %11 = vector.extract_strided_slice %7 {offsets = [256, 0], sizes = [256, 16], strides = [1, 1]} : vector<1024x16xf32> to vector<256x16xf32>
    %cst_7 = arith.constant dense<0.000000e+00> : vector<16xf32>
    %12 = vector.multi_reduction <add>, %11, %cst_7 [0] : vector<256x16xf32> to vector<16xf32>
    %13 = vector.shape_cast %12 : vector<16xf32> to vector<1x16xf32>
    %14 = vector.extract_strided_slice %7 {offsets = [512, 0], sizes = [256, 16], strides = [1, 1]} : vector<1024x16xf32> to vector<256x16xf32>
    %cst_8 = arith.constant dense<0.000000e+00> : vector<16xf32>
    %15 = vector.multi_reduction <add>, %14, %cst_8 [0] : vector<256x16xf32> to vector<16xf32>
    %16 = vector.shape_cast %15 : vector<16xf32> to vector<1x16xf32>
    %17 = vector.extract_strided_slice %7 {offsets = [768, 0], sizes = [256, 16], strides = [1, 1]} : vector<1024x16xf32> to vector<256x16xf32>
    %cst_9 = arith.constant dense<0.000000e+00> : vector<16xf32>
    %18 = vector.multi_reduction <add>, %17, %cst_9 [0] : vector<256x16xf32> to vector<16xf32>
    %19 = vector.shape_cast %18 : vector<16xf32> to vector<1x16xf32>
    %20 = tpu.concatenate %10, %13 in 0 : vector<1x16xf32>, vector<1x16xf32> -> vector<2x16xf32>
    %cst_10 = arith.constant 3.906250e-03 : f32
    %21 = vector.broadcast %cst_10 : f32 to vector<2x16xf32>
    %22 = arith.mulf %20, %21 : vector<2x16xf32>
    %23 = arith.truncf %22 : vector<2x16xf32> to vector<2x16xbf16>
    %24 = tpu.concatenate %16, %19 in 0 : vector<1x16xf32>, vector<1x16xf32> -> vector<2x16xf32>
    %cst_11 = arith.constant 3.906250e-03 : f32
    %25 = vector.broadcast %cst_11 : f32 to vector<2x16xf32>
    %26 = arith.mulf %24, %25 : vector<2x16xf32>
    %27 = arith.truncf %26 : vector<2x16xf32> to vector<2x16xbf16>
    %c0_12 = arith.constant 0 : index
    %c0_13 = arith.constant 0 : index
    %28 = vector.load %arg3[%c0_12, %c0_13] : memref<16x128xbf16, #tpu.memory_space<vmem>>, vector<16x128xbf16>
    %cst_14 = arith.constant dense<0.000000e+00> : vector<2x128xf32>
    %29 = tpu.matmul %23, %28, %cst_14 {dimension_numbers = #tpu.dot_dimension_numbers<[1], [0], [0], [1], [0, 0, 1, 1], [], []>} : vector<2x16xbf16>, vector<16x128xbf16>, vector<2x128xf32> -> vector<2x128xf32>
    %c0_15 = arith.constant 0 : index
    %c0_16 = arith.constant 0 : index
    %30 = vector.load %arg4[%c0_15, %c0_16] : memref<16x128xbf16, #tpu.memory_space<vmem>>, vector<16x128xbf16>
    %cst_17 = arith.constant dense<0.000000e+00> : vector<2x128xf32>
    %31 = tpu.matmul %27, %30, %cst_17 {dimension_numbers = #tpu.dot_dimension_numbers<[1], [0], [0], [1], [0, 0, 1, 1], [], []>} : vector<2x16xbf16>, vector<16x128xbf16>, vector<2x128xf32> -> vector<2x128xf32>
    %32 = arith.addf %29, %31 : vector<2x128xf32>
    %c0_18 = arith.constant 0 : index
    %c0_19 = arith.constant 0 : index
    %33 = vector.load %arg5[%c0_18, %c0_19] : memref<1x128xf32, #tpu.memory_space<vmem>>, vector<1x128xf32>
    %34 = vector.broadcast %33 : vector<1x128xf32> to vector<2x128xf32>
    %35 = arith.addf %32, %34 : vector<2x128xf32>
    %cst_20 = arith.constant 0.000000e+00 : f32
    %36 = vector.broadcast %cst_20 : f32 to vector<2x128xf32>
    %37 = arith.maximumf %35, %36 : vector<2x128xf32>
    %38 = arith.truncf %37 : vector<2x128xf32> to vector<2x128xbf16>
    %c0_21 = arith.constant 0 : index
    %c0_22 = arith.constant 0 : index
    %39 = vector.load %arg6[%c0_21, %c0_22] : memref<128x64xbf16, #tpu.memory_space<vmem>>, vector<128x64xbf16>
    %cst_23 = arith.constant dense<0.000000e+00> : vector<2x64xf32>
    %40 = tpu.matmul %38, %39, %cst_23 {dimension_numbers = #tpu.dot_dimension_numbers<[1], [0], [0], [1], [0, 0, 1, 1], [], []>} : vector<2x128xbf16>, vector<128x64xbf16>, vector<2x64xf32> -> vector<2x64xf32>
    %c0_24 = arith.constant 0 : index
    %c0_25 = arith.constant 0 : index
    %41 = vector.load %arg7[%c0_24, %c0_25] : memref<1x64xf32, #tpu.memory_space<vmem>>, vector<1x64xf32>
    %42 = vector.broadcast %41 : vector<1x64xf32> to vector<2x64xf32>
    %43 = arith.addf %40, %42 : vector<2x64xf32>
    %cst_26 = arith.constant 0.000000e+00 : f32
    %44 = vector.broadcast %cst_26 : f32 to vector<2x64xf32>
    %45 = arith.maximumf %43, %44 : vector<2x64xf32>
    %46 = arith.truncf %45 : vector<2x64xf32> to vector<2x64xbf16>
    %c0_27 = arith.constant 0 : index
    %c0_28 = arith.constant 0 : index
    %47 = vector.load %arg8[%c0_27, %c0_28] : memref<64x128xbf16, #tpu.memory_space<vmem>>, vector<64x128xbf16>
    %cst_29 = arith.constant dense<0.000000e+00> : vector<2x128xf32>
    %48 = tpu.matmul %46, %47, %cst_29 {dimension_numbers = #tpu.dot_dimension_numbers<[1], [0], [0], [1], [0, 0, 1, 1], [], []>} : vector<2x64xbf16>, vector<64x128xbf16>, vector<2x128xf32> -> vector<2x128xf32>
    %c0_30 = arith.constant 0 : index
    %c0_31 = arith.constant 0 : index
    %49 = vector.load %arg9[%c0_30, %c0_31] : memref<1x128xf32, #tpu.memory_space<vmem>>, vector<1x128xf32>
    %50 = vector.broadcast %49 : vector<1x128xf32> to vector<2x128xf32>
    %51 = arith.addf %48, %50 : vector<2x128xf32>
    %c0_32 = arith.constant 0 : index
    %c0_33 = arith.constant 0 : index
    %52 = vector.load %arg10[%c0_32, %c0_33] : memref<2x128xf32, #tpu.memory_space<vmem>>, vector<2x128xf32>
    tpu.vector_store %arg10[%c0_32, %c0_33], %51 {strides = array<i32>} : memref<2x128xf32, #tpu.memory_space<vmem>>, vector<2x128xf32>,
    return
  }
}

</mosaic_0001>

<bundles_post_ra>
// kernel: ncnv2_forward.1
= control target key start
LH: loop header
LB: loop body
LE: loop exit
PB: predicated region body
PF: predicated region fallthrough
CT: control target
= control target key end

     0   :  { %vm512_vm0 = vcmask 293888   ;;  %vm705_vm1 = vcmask 1041408   ;;  %s3258_s0 = inlined_call_operand.vmem [shape: bf16[1024,36], index: 0, kind: input, shape index: {}]   ;;  %s3259_s1 = inlined_call_operand.vmem [shape: bf16[36,16], index: 1, kind: input, shape index: {}]   ;;  %s3260_s2 = inlined_call_operand.vmem [shape: f32[1,16], index: 2, kind: input, shape index: {}]   ;;  %s3261_s3 = inlined_call_operand.vmem [shape: bf16[16,128], index: 3, kind: input, shape index: {}]   ;;  %s3262_s4 = inlined_call_operand.vmem [shape: bf16[16,128], index: 4, kind: input, shape index: {}]   ;;  %s3263_s5 = inlined_call_operand.vmem [shape: f32[1,128], index: 5, kind: input, shape index: {}]   ;;  %s3264_s6 = inlined_call_operand.vmem [shape: bf16[128,64], index: 6, kind: input, shape index: {}]   ;;  %s3265_s7 = inlined_call_operand.vmem [shape: f32[1,64], index: 7, kind: input, shape index: {}]   ;;  %s3266_s8 = inlined_call_operand.vmem [shape: bf16[64,128], index: 8, kind: input, shape index: {}]   ;;  %s3267_s9 = inlined_call_operand.vmem [shape: f32[1,128], index: 9, kind: input, shape index: {}]   ;;  %s3268_s10 = inlined_call_operand.hbm [shape: f32[2,128], index: 10, kind: output, shape index: {}]  }
   0x1   :  { %v2415_v0 = vld [vmem:[%s3259_s1] sm:$0xff]   ;;  %v2416_v1 = vld [vmem:[%s3259_s1 + $0x8] sm:$0xff]   ;;  %v2417_v2 = vld [vmem:[%s3259_s1 + $0x10] ss:$0 sps:$4 sm:$0x33]  }
   0x2   :  { %2226 = vmatprep.subr.bf16.mxu0 %v2415_v0  ;;  %v2418_v3 = vld [vmem:[%s3258_s0] sm:$0xff]   ;;  %2404 = vmatprep.subr.bf16.mxu1 %v2415_v0  ;;  %v707_v4 = vsel %vm705_vm1, %v2417_v2, 0  ;;  %v2419_v5 = vld [vmem:[%s3258_s0 + $0x8] sm:$0xff]   ;;  %v2420_v6 = vld [vmem:[%s3258_s0 + $0x10] sm:$0xff]  }
   0x3   :  { %2227 = vmatpush3.bf16.msra.mxu0 %v2415_v0  ;;  %2407 = vmatpush3.bf16.msra.mxu1 %v2415_v0  ;;  %v2421_v7 = vld [vmem:[%s3258_s0 + $0x18] sm:$0xff]   ;;  %v2422_v8 = vld [vmem:[%s3258_s0 + $0x20] sm:$0xff]   ;;  %v2423_v9 = vld [vmem:[%s3258_s0 + $0x28] sm:$0xff]  }
   0x4   :  { %2228 = vmatprep.subr.bf16.mxu0 %v2416_v1  ;;  %2232 = vmatprep.mubr.msk.bf16.mxu0 %vm512_vm0, %v2418_v3  ;;  %v2440_v10 = vld [vmem:[%s3258_s0 + $0x140] sm:$0xff]   ;;  %v2441_v11 = vld [vmem:[%s3258_s0 + $0x148] sm:$0xff]   ;;  %v2424_v12 = vld [vmem:[%s3258_s0 + $0x30] sm:$0xff]  }
   0x5   :  { %2405 = vmatprep.subr.bf16.mxu1 %v2416_v1  ;;  %2312 = vmatprep.mubr.msk.bf16.mxu1 %vm512_vm0, %v2440_v10  ;;  %v2444_v13 = vld [vmem:[%s3258_s0 + $0x150] sm:$0xff]   ;;  %v2445_v14 = vld [vmem:[%s3258_s0 + $0x158] sm:$0xff]   ;;  %v2448_v15 = vld [vmem:[%s3258_s0 + $0x160] sm:$0xff]  }
   0x6   :  { %v2425_v16 = vld [vmem:[%s3258_s0 + $0x38] sm:$0xff]   ;;  %v2426_v17 = vld [vmem:[%s3258_s0 + $0x40] sm:$0xff]   ;;  %v2449_v18 = vld [vmem:[%s3258_s0 + $0x168] sm:$0xff]  }
   0x7   :  { %2229 = vmatpush3.bf16.msra.mxu0 %v2416_v1  ;;  %2408 = vmatpush3.bf16.msra.mxu1 %v2416_v1  ;;  %v2452_v19 = vld [vmem:[%s3258_s0 + $0x170] sm:$0xff]   ;;  %v2427_v20 = vld [vmem:[%s3258_s0 + $0x48] sm:$0xff]   ;;  %v2453_v22 = vld [vmem:[%s3258_s0 + $0x178] sm:$0xff]  }
   0x8   :  { %2410 = vmatprep.subr.msk.bf16.mxu0 %vm705_vm1, %v2417_v2  ;;  %2411 = vmatprep.subr.msk.bf16.mxu1 %vm705_vm1, %v2417_v2  ;;  %v2428_v21 = vld [vmem:[%s3258_s0 + $0x50] sm:$0xff]   ;;  %v2456_v23 = vld [vmem:[%s3258_s0 + $0x180] sm:$0xff]   ;;  %v2429_v24 = vld [vmem:[%s3258_s0 + $0x58] sm:$0xff]  }
   0x9   :  { %v2430_v25 = vld [vmem:[%s3258_s0 + $0x60] sm:$0xff]   ;;  %v2457_v26 = vld [vmem:[%s3258_s0 + $0x188] sm:$0xff]   ;;  %v2460_v27 = vld [vmem:[%s3258_s0 + $0x190] sm:$0xff]  }
   0xa   :  { %v2431_v28 = vld [vmem:[%s3258_s0 + $0x68] sm:$0xff]   ;;  %v2432_v29 = vld [vmem:[%s3258_s0 + $0x70] sm:$0xff]   ;;  %v2433_v30 = vld [vmem:[%s3258_s0 + $0x78] sm:$0xff]  }
   0xb   :  { %2231 = vmatpush3.bf16.msra.mxu0 %v707_v4  ;;  %2409 = vmatpush3.bf16.msra.mxu1 %v707_v4  ;;  %v2461_v31 = vld [vmem:[%s3258_s0 + $0x198] sm:$0xff]   ;;  %v2464_v32 = vld [vmem:[%s3258_s0 + $0x1a0] sm:$0xff]   ;;  %v2465_v34 = vld [vmem:[%s3258_s0 + $0x1a8] sm:$0xff]  }
   0xc   :  { %v2434_v33 = vld [vmem:[%s3258_s0 + $0x80] sm:$0xff]   ;;  %v2468_v35 = vld [vmem:[%s3258_s0 + $0x1b0] sm:$0xff]   ;;  %v2435_v36 = vld [vmem:[%s3258_s0 + $0x88] sm:$0xff]  }
   0xd   :  { %v2436_v37 = vld [vmem:[%s3258_s0 + $0x90] sm:$0xff]  }
   0xe   :  { %2233 = vmatmul.mubr.msk.bf16.vlgmr.msra.gmra.mrb[0].mxu0 %vm512_vm0, %v2419_v5  ;;  %2313 = vmatmul.mubr.msk.bf16.vlgmr.msra.gmra.mrb[0].mxu1 %vm512_vm0, %v2441_v11 }
   0xf   :  { %2236 = vmatprep.mubr.msk.bf16.mxu0 %vm512_vm0, %v2420_v6  ;;  %2316 = vmatprep.mubr.msk.bf16.mxu1 %vm512_vm0, %v2444_v13 }
  0x16   :  { %2237 = vmatmul.mubr.msk.bf16.gmra.mrb[4].mxu0 %vm512_vm0, %v2421_v7  ;;  %2317 = vmatmul.mubr.msk.bf16.gmra.mrb[4].mxu1 %vm512_vm0, %v2445_v14 }
  0x17   :  { %2240 = vmatprep.mubr.msk.bf16.mxu0 %vm512_vm0, %v2422_v8  ;;  %2320 = vmatprep.mubr.msk.bf16.mxu1 %vm512_vm0, %v2448_v15 }
  0x1e   :  { %2241 = vmatmul.mubr.msk.bf16.gmra.mrb[8].mxu0 %vm512_vm0, %v2423_v9  ;;  %2321 = vmatmul.mubr.msk.bf16.gmra.mrb[8].mxu1 %vm512_vm0, %v2449_v18 }
  0x1f   :  { %2244 = vmatprep.mubr.msk.bf16.mxu0 %vm512_vm0, %v2424_v12  ;;  %2324 = vmatprep.mubr.msk.bf16.mxu1 %vm512_vm0, %v2452_v19 }
  0x26   :  { %2245 = vmatmul.mubr.msk.bf16.gmra.mrb[12].mxu0 %vm512_vm0, %v2425_v16  ;;  %2325 = vmatmul.mubr.msk.bf16.gmra.mrb[12].mxu1 %vm512_vm0, %v2453_v22 }
  0x27   :  { %2248 = vmatprep.mubr.msk.bf16.mxu0 %vm512_vm0, %v2426_v17  ;;  %2328 = vmatprep.mubr.msk.bf16.mxu1 %vm512_vm0, %v2456_v23 }
  0x2e   :  { %2249 = vmatmul.mubr.msk.bf16.gmra.mrb[16].mxu0 %vm512_vm0, %v2427_v20  ;;  %2329 = vmatmul.mubr.msk.bf16.gmra.mrb[16].mxu1 %vm512_vm0, %v2457_v26 }
  0x2f   :  { %2252 = vmatprep.mubr.msk.bf16.mxu0 %vm512_vm0, %v2428_v21  ;;  %2332 = vmatprep.mubr.msk.bf16.mxu1 %vm512_vm0, %v2460_v27 }
  0x36   :  { %2253 = vmatmul.mubr.msk.bf16.gmra.mrb[20].mxu0 %vm512_vm0, %v2429_v24  ;;  %2333 = vmatmul.mubr.msk.bf16.gmra.mrb[20].mxu1 %vm512_vm0, %v2461_v31 }
  0x37   :  { %2256 = vmatprep.mubr.msk.bf16.mxu0 %vm512_vm0, %v2430_v25  ;;  %2336 = vmatprep.mubr.msk.bf16.mxu1 %vm512_vm0, %v2464_v32 }
  0x3e   :  { %2257 = vmatmul.mubr.msk.bf16.gmra.mrb[24].mxu0 %vm512_vm0, %v2431_v28  ;;  %2337 = vmatmul.mubr.msk.bf16.gmra.mrb[24].mxu1 %vm512_vm0, %v2465_v34 }
  0x3f   :  { %2260 = vmatprep.mubr.msk.bf16.mxu0 %vm512_vm0, %v2432_v29 }
  0x46   :  { %2261 = vmatmul.mubr.msk.bf16.gmra.mrb[28].mxu0 %vm512_vm0, %v2433_v30 }
  0x47   :  { %2264 = vmatprep.mubr.msk.bf16.mxu0 %vm512_vm0, %v2434_v33 }
  0x48   :  { %15 = vsyncpa [#allocation3], 0  ;;  %2340 = vmatprep.mubr.msk.bf16.mxu1 %vm512_vm0, %v2468_v35  ;;  %v2469_v38 = vld [vmem:[%s3258_s0 + $0x1b8] sm:$0xff]   ;;  %v2472_v39 = vld [vmem:[%s3258_s0 + $0x1c0] sm:$0xff]   ;;  %v2521_v4 = vmov 0.0   ;;  %vm1382_vm2 = vcmask 130048  }
  0x49   :  { %v2437_v40 = vld [vmem:[%s3258_s0 + $0x98] sm:$0xff]   ;;  %v2438_v41 = vld [vmem:[%s3258_s0 + $0xa0] sm:$0xff]   ;;  %2341 = vmatmul.mubr.msk.bf16.gmra.mrb[28].mxu1 %vm512_vm0, %v2469_v38  ;;  %v2473_v42 = vld [vmem:[%s3258_s0 + $0x1c8] sm:$0xff]   ;;  %2360 = vmatprep.subr.bf16.mxu1 %v2521_v4  ;;  %vm2522_vm3 = vmmov 0   ;;  %vm1659_vm4 = vcmask 1040384   ;;  %vm1930_vm5 = vcmask 523264  }
  0x4a   :  { %2344 = vmatprep.mubr.msk.bf16.mxu1 %vm512_vm0, %v2472_v39  ;;  %v2476_v43 = vld [vmem:[%s3258_s0 + $0x1d0] sm:$0xff]   ;;  %v2439_v44 = vld [vmem:[%s3258_s0 + $0xa8] sm:$0xff]   ;;  %v2477_v46 = vld [vmem:[%s3258_s0 + $0x1d8] sm:$0xff]   ;;  %s2523_s27 = smov [#allocation2]  }
  0x4b   :  { %v2442_v45 = vld [vmem:[%s3258_s0 + $0xb0] sm:$0xff]   ;;  %v2478_v47 = vld [vmem:[%s3258_s0 + $0x1e0] sm:$0xff]   ;;  %v2443_v48 = vld [vmem:[%s3258_s0 + $0xb8] sm:$0xff]  }
  0x4c   :  { %v2446_v49 = vld [vmem:[%s3258_s0 + $0xc0] sm:$0xff]   ;;  %v2479_v50 = vld [vmem:[%s3258_s0 + $0x1e8] sm:$0xff]   ;;  %v2480_v51 = vld [vmem:[%s3258_s0 + $0x1f0] sm:$0xff]  }
  0x4d   :  { %v2447_v52 = vld [vmem:[%s3258_s0 + $0xc8] sm:$0xff]   ;;  %v2450_v53 = vld [vmem:[%s3258_s0 + $0xd0] sm:$0xff]   ;;  %v2481_v54 = vld [vmem:[%s3258_s0 + $0x1f8] sm:$0xff]  }
  0x4e   :  { %2265 = vmatmul.mubr.msk.bf16.gmra.mrb[32].mxu0 %vm512_vm0, %v2435_v36  ;;  %v2451_v55 = vld [vmem:[%s3258_s0 + $0xd8] sm:$0xff]   ;;  %v2454_v56 = vld [vmem:[%s3258_s0 + $0xe0] sm:$0xff]   ;;  %v2455_v57 = vld [vmem:[%s3258_s0 + $0xe8] sm:$0xff]  }
  0x4f   :  { %2268 = vmatprep.mubr.msk.bf16.mxu0 %vm512_vm0, %v2436_v37  ;;  %v2458_v58 = vld [vmem:[%s3258_s0 + $0xf0] sm:$0xff]   ;;  %v2459_v59 = vld [vmem:[%s3258_s0 + $0xf8] sm:$0xff]   ;;  %v2462_v60 = vld [vmem:[%s3258_s0 + $0x100] sm:$0xff]  }
  0x50   :  { %v2463_v61 = vld [vmem:[%s3258_s0 + $0x108] sm:$0xff]   ;;  %v2466_v62 = vld [vmem:[%s3258_s0 + $0x110] sm:$0xff]   ;;  %v2467_v63 = vld [vmem:[%s3258_s0 + $0x118] sm:$0xff]  }
  0x51   :  { %2345 = vmatmul.mubr.msk.bf16.gmra.mrb[32].mxu1 %vm512_vm0, %v2473_v42  ;;  %v2470_v0 = vld [vmem:[%s3258_s0 + $0x120] sm:$0xff]   ;;  %v2471_v1 = vld [vmem:[%s3258_s0 + $0x128] sm:$0xff]   ;;  %v2474_v2 = vld [vmem:[%s3258_s0 + $0x130] sm:$0xff]  }
  0x52   :  { %2348 = vmatprep.mubr.msk.bf16.mxu1 %vm512_vm0, %v2476_v43  ;;  %v2475_v3 = vld [vmem:[%s3258_s0 + $0x138] sm:$0xff]   ;;  %v2482_v5 = vld [vmem:[%s3262_s4] sm:$0xff]  }
  0x53   :  { %v2851_v6 = vld [vmem:[%s3260_s2] ss:$0 sm:$0xff]  ;;  %2361 = vmatpush3.bf16.msra.mxu1 %v2482_v5 }
  0x54   :  { %2366 = vmatprep.subr.bf16.mxu1 %v2521_v4 }
  0x56   :  { %2269 = vmatmul.mubr.msk.bf16.gmra.mrb[36].mxu0 %vm512_vm0, %v2437_v40 }
  0x57   :  { %2272 = vmatprep.mubr.msk.bf16.mxu0 %vm512_vm0, %v2438_v41 }
  0x59   :  { %2349 = vmatmul.mubr.msk.bf16.gmra.mrb[36].mxu1 %vm512_vm0, %v2477_v46 }
  0x5a   :  { %2352 = vmatprep.mubr.msk.bf16.mxu1 %vm512_vm0, %v2478_v47 }
  0x5e   :  { %2273 = vmatmul.mubr.msk.bf16.gmra.mrb[40].mxu0 %vm512_vm0, %v2439_v44 }
  0x5f   :  { %2276 = vmatprep.mubr.msk.bf16.mxu0 %vm512_vm0, %v2442_v45 }
  0x61   :  { %2353 = vmatmul.mubr.msk.bf16.gmra.mrb[40].mxu1 %vm512_vm0, %v2479_v50 }
  0x62   :  { %2356 = vmatprep.mubr.msk.bf16.mxu1 %vm512_vm0, %v2480_v51 }
  0x66   :  { %2277 = vmatmul.mubr.msk.bf16.gmra.mrb[44].mxu0 %vm512_vm0, %v2443_v48 }
  0x67   :  { %2280 = vmatprep.mubr.msk.bf16.mxu0 %vm512_vm0, %v2446_v49 }
  0x69   :  { %2357 = vmatmul.mubr.msk.bf16.gmra.mrb[44].mxu1 %vm512_vm0, %v2481_v54 }
  0x6a   :  { %2362 = vmatprep.mubr.msk.bf16.mxu1 %vm2522_vm3, %v2521_v4 }
  0x6e   :  { %2281 = vmatmul.mubr.msk.bf16.gmra.mrb[48].mxu0 %vm512_vm0, %v2447_v52 }
  0x6f   :  { %2284 = vmatprep.mubr.msk.bf16.mxu0 %vm512_vm0, %v2450_v53 }
  0x76   :  { %2285 = vmatmul.mubr.msk.bf16.gmra.mrb[52].mxu0 %vm512_vm0, %v2451_v55 }
  0x77   :  { %2288 = vmatprep.mubr.msk.bf16.mxu0 %vm512_vm0, %v2454_v56 }
  0x7e   :  { %2289 = vmatmul.mubr.msk.bf16.gmra.mrb[56].mxu0 %vm512_vm0, %v2455_v57 }
  0x7f   :  { %2292 = vmatprep.mubr.msk.bf16.mxu0 %vm512_vm0, %v2458_v58 }
  0x86   :  { %2293 = vmatmul.mubr.msk.bf16.gmra.mrb[60].mxu0 %vm512_vm0, %v2459_v59 }
  0x87   :  { %2296 = vmatprep.mubr.msk.bf16.mxu0 %vm512_vm0, %v2462_v60 }
  0x8e   :  { %2297 = vmatmul.mubr.msk.bf16.gmra.mrb[64].mxu0 %vm512_vm0, %v2463_v61 }
  0x8f   :  { %2300 = vmatprep.mubr.msk.bf16.mxu0 %vm512_vm0, %v2466_v62 }
  0x96   :  { %2301 = vmatmul.mubr.msk.bf16.gmra.mrb[68].mxu0 %vm512_vm0, %v2467_v63 }
  0x97   :  { %2304 = vmatprep.mubr.msk.bf16.mxu0 %vm512_vm0, %v2470_v0 }
  0x9e   :  { %2305 = vmatmul.mubr.msk.bf16.gmra.mrb[72].mxu0 %vm512_vm0, %v2471_v1 }
  0x9f   :  { %2308 = vmatprep.mubr.msk.bf16.mxu0 %vm512_vm0, %v2474_v2 }
  0xa6   :  { %2309 = vmatmul.mubr.msk.bf16.gmra.mrb[76].mxu0 %vm512_vm0, %v2475_v3 }
  0xe1   :  { %v2234_v7 = vpop.f32.mrb[0].mxu0  ;;  %v2867_v38 = vpop.f32.mrb[0].mxu1 }
  0xe2   :  { %v743_v8 = vpop.f32.mrb[1].mxu0  ;;  %v752_v9 = vadd.f32 %v2234_v7, %v2851_v6  ;;  %v2869_v40 = vpop.f32.mrb[1].mxu1 }
  0xe3   :  { %v744_v10 = vadd.f32 %v2851_v6, %v743_v8  ;;  %v2235_v11 = vpop.f32.mrb[2].mxu0  ;;  %v2872_v44 = vpop.f32.mrb[2].mxu1 }
  0xe4   :  { %v746_v12 = vpop.f32.mrb[3].mxu0  ;;  %v755_v14 = vadd.f32 %v2235_v11, %v2851_v6  ;;  %v1256_v16 = vmax.f32 %v752_v9, 0.0  ;;  %v2874_v47 = vpop.f32.mrb[3].mxu1 }
  0xe5   :  { %v1254_v13 = vmax.f32 %v744_v10, 0.0  ;;  %v747_v15 = vadd.f32 %v2851_v6, %v746_v12 }
  0xe6   :  { %v1257_v19 = vmax.f32 %v755_v14, 0.0  ;;  %v1386_v24 = vsel %vm1382_vm2, %v1256_v16, 0.0 }
  0xe7   :  { %v1255_v17 = vmax.f32 %v747_v15, 0.0  ;;  %v1383_v18 = vsel %vm1382_vm2, %v1254_v13, 0.0 }
  0xe8   :  { %v1388_v30 = vsel %vm1382_vm2, %v1257_v19, 0.0 }
  0xe9   :  { %v1384_v20 = vsel %vm1382_vm2, %v1255_v17, 0.0  ;;  %v2238_v21 = vpop.f32.mrb[4].mxu0  ;;  %v2883_v62 = vpop.f32.mrb[4].mxu1 }
  0xea   :  { %v1385_v22 = vadd.f32 %v1384_v20, %v1383_v18  ;;  %v759_v23 = vpop.f32.mrb[5].mxu0  ;;  %v768_v25 = vadd.f32 %v2238_v21, %v2851_v6  ;;  %v2885_v0 = vpop.f32.mrb[5].mxu1 }
  0xeb   :  { %v760_v26 = vadd.f32 %v2851_v6, %v759_v23  ;;  %v2239_v27 = vpop.f32.mrb[6].mxu0  ;;  %v2888_v5 = vpop.f32.mrb[6].mxu1 }
  0xec   :  { %v1387_v28 = vadd.f32 %v1386_v24, %v1385_v22  ;;  %v762_v29 = vpop.f32.mrb[7].mxu0  ;;  %v771_v32 = vadd.f32 %v2239_v27, %v2851_v6  ;;  %v1260_v35 = vmax.f32 %v768_v25, 0.0  ;;  %v2890_v9 = vpop.f32.mrb[7].mxu1 }
  0xed   :  { %v1258_v31 = vmax.f32 %v760_v26, 0.0  ;;  %v763_v33 = vadd.f32 %v2851_v6, %v762_v29 }
  0xee   :  { %v1389_v34 = vadd.f32 %v1388_v30, %v1387_v28  ;;  %v1261_v41 = vmax.f32 %v771_v32, 0.0  ;;  %v1394_v48 = vsel %vm1382_vm2, %v1260_v35, 0.0 }
  0xef   :  { %v1390_v36 = vsel %vm1382_vm2, %v1258_v31, 0.0  ;;  %v1259_v37 = vmax.f32 %v763_v33, 0.0 }
  0xf0   :  { %v1391_v39 = vadd.f32 %v1390_v36, %v1389_v34  ;;  %v1396_v54 = vsel %vm1382_vm2, %v1261_v41, 0.0 }
  0xf1   :  { %v1392_v42 = vsel %vm1382_vm2, %v1259_v37, 0.0  ;;  %v2242_v43 = vpop.f32.mrb[8].mxu0  ;;  %v2899_v24 = vpop.f32.mrb[8].mxu1 }
  0xf2   :  { %v1393_v45 = vadd.f32 %v1392_v42, %v1391_v39  ;;  %v775_v46 = vpop.f32.mrb[9].mxu0  ;;  %v784_v49 = vadd.f32 %v2242_v43, %v2851_v6  ;;  %v2901_v26 = vpop.f32.mrb[9].mxu1 }
  0xf3   :  { %v776_v50 = vadd.f32 %v2851_v6, %v775_v46  ;;  %v2243_v51 = vpop.f32.mrb[10].mxu0  ;;  %v2904_v30 = vpop.f32.mrb[10].mxu1 }
  0xf4   :  { %v1395_v52 = vadd.f32 %v1394_v48, %v1393_v45  ;;  %v778_v53 = vpop.f32.mrb[11].mxu0  ;;  %v787_v56 = vadd.f32 %v2243_v51, %v2851_v6  ;;  %v1264_v59 = vmax.f32 %v784_v49, 0.0  ;;  %v2906_v33 = vpop.f32.mrb[11].mxu1 }
  0xf5   :  { %v1262_v55 = vmax.f32 %v776_v50, 0.0  ;;  %v779_v57 = vadd.f32 %v2851_v6, %v778_v53 }
  0xf6   :  { %v1397_v58 = vadd.f32 %v1396_v54, %v1395_v52  ;;  %v1265_v1 = vmax.f32 %v787_v56, 0.0  ;;  %v1402_v10 = vsel %vm1382_vm2, %v1264_v59, 0.0 }
  0xf7   :  { %v1398_v60 = vsel %vm1382_vm2, %v1262_v55, 0.0  ;;  %v1263_v61 = vmax.f32 %v779_v57, 0.0 }
  0xf8   :  { %v1399_v63 = vadd.f32 %v1398_v60, %v1397_v58  ;;  %v1404_v16 = vsel %vm1382_vm2, %v1265_v1, 0.0 }
  0xf9   :  { %v1400_v2 = vsel %vm1382_vm2, %v1263_v61, 0.0  ;;  %v2246_v3 = vpop.f32.mrb[12].mxu0  ;;  %v2915_v52 = vpop.f32.mrb[12].mxu1 }
  0xfa   :  { %v1401_v7 = vadd.f32 %v1400_v2, %v1399_v63  ;;  %v791_v8 = vpop.f32.mrb[13].mxu0  ;;  %v800_v11 = vadd.f32 %v2246_v3, %v2851_v6  ;;  %v2917_v54 = vpop.f32.mrb[13].mxu1 }
  0xfb   :  { %v792_v12 = vadd.f32 %v2851_v6, %v791_v8  ;;  %v2247_v13 = vpop.f32.mrb[14].mxu0  ;;  %v2920_v58 = vpop.f32.mrb[14].mxu1 }
  0xfc   :  { %v1403_v14 = vadd.f32 %v1402_v10, %v1401_v7  ;;  %v794_v15 = vpop.f32.mrb[15].mxu0  ;;  %v803_v18 = vadd.f32 %v2247_v13, %v2851_v6  ;;  %v1268_v21 = vmax.f32 %v800_v11, 0.0  ;;  %v2923_v63 = vpop.f32.mrb[15].mxu1 }
  0xfd   :  { %v1266_v17 = vmax.f32 %v792_v12, 0.0  ;;  %v795_v19 = vadd.f32 %v2851_v6, %v794_v15 }
  0xfe   :  { %v1405_v20 = vadd.f32 %v1404_v16, %v1403_v14  ;;  %v1269_v27 = vmax.f32 %v803_v18, 0.0  ;;  %v1410_v34 = vsel %vm1382_vm2, %v1268_v21, 0.0 }
  0xff   :  { %v1406_v22 = vsel %vm1382_vm2, %v1266_v17, 0.0  ;;  %v1267_v23 = vmax.f32 %v795_v19, 0.0 }
 0x100   :  { %v1407_v25 = vadd.f32 %v1406_v22, %v1405_v20  ;;  %v1412_v42 = vsel %vm1382_vm2, %v1269_v27, 0.0 }
 0x101   :  { %v1408_v28 = vsel %vm1382_vm2, %v1267_v23, 0.0  ;;  %v2250_v29 = vpop.f32.mrb[16].mxu0  ;;  %v2330_v18 = vpop.f32.mrb[16].mxu1 }
 0x102   :  { %v1409_v31 = vadd.f32 %v1408_v28, %v1407_v25  ;;  %v807_v32 = vpop.f32.mrb[17].mxu0  ;;  %v816_v35 = vadd.f32 %v2250_v29, %v2851_v6  ;;  %v1136_v20 = vadd.f32 %v2330_v18, %v2851_v6  ;;  %v1127_v21 = vpop.f32.mrb[17].mxu1 }
 0x103   :  { %v808_v36 = vadd.f32 %v2851_v6, %v807_v32  ;;  %v2251_v37 = vpop.f32.mrb[18].mxu0  ;;  %v1128_v27 = vadd.f32 %v2851_v6, %v1127_v21  ;;  %v2331_v28 = vpop.f32.mrb[18].mxu1 }
 0x104   :  { %v1411_v39 = vadd.f32 %v1410_v34, %v1409_v31  ;;  %v810_v41 = vpop.f32.mrb[19].mxu0  ;;  %v819_v45 = vadd.f32 %v2251_v37, %v2851_v6  ;;  %v1272_v49 = vmax.f32 %v816_v35, 0.0  ;;  %v1139_v35 = vadd.f32 %v2331_v28, %v2851_v6 }
 0x105   :  { %v1270_v43 = vmax.f32 %v808_v36, 0.0  ;;  %v811_v46 = vadd.f32 %v2851_v6, %v810_v41  ;;  %v1130_v36 = vpop.f32.mrb[19].mxu1  ;;  %v1352_v41 = vmax.f32 %v1136_v20, 0.0 }
 0x106   :  { %v1413_v48 = vadd.f32 %v1412_v42, %v1411_v39  ;;  %v1273_v55 = vmax.f32 %v819_v45, 0.0  ;;  %v1418_v1 = vsel %vm1382_vm2, %v1272_v49, 0.0  ;;  %v1350_v42 = vmax.f32 %v1128_v27, 0.0 }
 0x107   :  { %v1414_v50 = vsel %vm1382_vm2, %v1270_v43, 0.0  ;;  %v1271_v51 = vmax.f32 %v811_v46, 0.0  ;;  %v1131_v43 = vadd.f32 %v2851_v6, %v1130_v36 }
 0x108   :  { %v1415_v53 = vadd.f32 %v1414_v50, %v1413_v48  ;;  %v1420_v10 = vsel %vm1382_vm2, %v1273_v55, 0.0  ;;  %v1353_v55 = vmax.f32 %v1139_v35, 0.0 }
 0x109   :  { %v1416_v56 = vsel %vm1382_vm2, %v1271_v51, 0.0  ;;  %v2254_v57 = vpop.f32.mrb[20].mxu0 }
 0x10a   :  { %v1417_v59 = vadd.f32 %v1416_v56, %v1415_v53  ;;  %v832_v60 = vadd.f32 %v2254_v57, %v2851_v6  ;;  %v823_v61 = vpop.f32.mrb[21].mxu0  ;;  %v1590_v57 = vsel %vm1382_vm2, %v1350_v42, 0.0 }
 0x10b   :  { %v824_v2 = vadd.f32 %v2851_v6, %v823_v61  ;;  %v2255_v3 = vpop.f32.mrb[22].mxu0 }
 0x10c   :  { %v1419_v7 = vadd.f32 %v1418_v1, %v1417_v59  ;;  %v826_v8 = vpop.f32.mrb[23].mxu0  ;;  %v835_v12 = vadd.f32 %v2255_v3, %v2851_v6  ;;  %v1276_v14 = vmax.f32 %v832_v60, 0.0  ;;  %v1351_v59 = vmax.f32 %v1131_v43, 0.0  ;;  %v2334_v3 = vpop.f32.mrb[20].mxu1 }
 0x10d   :  { %v1274_v11 = vmax.f32 %v824_v2, 0.0  ;;  %v827_v13 = vadd.f32 %v2851_v6, %v826_v8  ;;  %v1593_v2 = vsel %vm1382_vm2, %v1352_v41, 0.0 }
 0x10e   :  { %v1421_v15 = vadd.f32 %v1420_v10, %v1419_v7  ;;  %v1277_v22 = vmax.f32 %v835_v12, 0.0  ;;  %v1426_v29 = vsel %vm1382_vm2, %v1276_v14, 0.0  ;;  %v1591_v10 = vsel %vm1382_vm2, %v1351_v59, 0.0  ;;  %v1143_v12 = vpop.f32.mrb[21].mxu1 }
 0x10f   :  { %v1422_v16 = vsel %vm1382_vm2, %v1274_v11, 0.0  ;;  %v1275_v17 = vmax.f32 %v827_v13, 0.0  ;;  %v1152_v11 = vadd.f32 %v2334_v3, %v2851_v6  ;;  %v2335_v18 = vpop.f32.mrb[22].mxu1 }
 0x110   :  { %v1423_v19 = vadd.f32 %v1422_v16, %v1421_v15  ;;  %v1428_v50 = vsel %vm1382_vm2, %v1277_v22, 0.0  ;;  %v1595_v15 = vsel %vm1382_vm2, %v1353_v55, 0.0  ;;  %v1592_v16 = vadd.f32 %v1591_v10, %v1590_v57 }
 0x111   :  { %v1424_v23 = vsel %vm1382_vm2, %v1275_v17, 0.0  ;;  %v2258_v25 = vpop.f32.mrb[24].mxu0  ;;  %v1144_v17 = vadd.f32 %v2851_v6, %v1143_v12  ;;  %v1356_v22 = vmax.f32 %v1152_v11, 0.0 }
 0x112   :  { %v1425_v31 = vadd.f32 %v1424_v23, %v1423_v19  ;;  %v848_v32 = vadd.f32 %v2258_v25, %v2851_v6  ;;  %v839_v34 = vpop.f32.mrb[25].mxu0  ;;  %v1155_v23 = vadd.f32 %v2335_v18, %v2851_v6  ;;  %v1146_v25 = vpop.f32.mrb[23].mxu1 }
 0x113   :  { %v840_v37 = vadd.f32 %v2851_v6, %v839_v34  ;;  %v2259_v39 = vpop.f32.mrb[26].mxu0 }
 0x114   :  { %v1427_v45 = vadd.f32 %v1426_v29, %v1425_v31  ;;  %v1280_v46 = vmax.f32 %v848_v32, 0.0  ;;  %v851_v48 = vadd.f32 %v2259_v39, %v2851_v6  ;;  %v842_v49 = vpop.f32.mrb[27].mxu0  ;;  %v1594_v29 = vadd.f32 %v1593_v2, %v1592_v16 }
 0x115   :  { %v1278_v51 = vmax.f32 %v840_v37, 0.0  ;;  %v843_v53 = vadd.f32 %v2851_v6, %v842_v49  ;;  %v1354_v31 = vmax.f32 %v1144_v17, 0.0  ;;  %v1147_v32 = vadd.f32 %v2851_v6, %v1146_v25 }
 0x116   :  { %v1429_v56 = vadd.f32 %v1428_v50, %v1427_v45  ;;  %v1434_v60 = vsel %vm1382_vm2, %v1280_v46, 0.0  ;;  %v1281_v8 = vmax.f32 %v851_v48, 0.0  ;;  %v1596_v43 = vadd.f32 %v1595_v15, %v1594_v29 }
 0x117   :  { %v1430_v61 = vsel %vm1382_vm2, %v1278_v51, 0.0  ;;  %v1279_v1 = vmax.f32 %v843_v53, 0.0  ;;  %v1597_v45 = vsel %vm1382_vm2, %v1354_v31, 0.0  ;;  %v1601_v48 = vsel %vm1382_vm2, %v1356_v22, 0.0 }
 0x118   :  { %v1431_v7 = vadd.f32 %v1430_v61, %v1429_v56  ;;  %v1436_v34 = vsel %vm1382_vm2, %v1281_v8, 0.0  ;;  %v1357_v49 = vmax.f32 %v1155_v23, 0.0  ;;  %v1598_v53 = vadd.f32 %v1597_v45, %v1596_v43  ;;  %v2338_v56 = vpop.f32.mrb[24].mxu1 }
 0x119   :  { %v1432_v13 = vsel %vm1382_vm2, %v1279_v1, 0.0  ;;  %v2262_v14 = vpop.f32.mrb[28].mxu0  ;;  %v1355_v55 = vmax.f32 %v1147_v32, 0.0  ;;  %v1168_v61 = vadd.f32 %v2338_v56, %v2851_v6  ;;  %v1159_v1 = vpop.f32.mrb[25].mxu1 }
 0x11a   :  { %v1433_v19 = vadd.f32 %v1432_v13, %v1431_v7  ;;  %v864_v20 = vadd.f32 %v2262_v14, %v2851_v6  ;;  %v855_v21 = vpop.f32.mrb[29].mxu0  ;;  %v1160_v8 = vadd.f32 %v2851_v6, %v1159_v1  ;;  %v2339_v10 = vpop.f32.mrb[26].mxu1  ;;  %v1603_v14 = vsel %vm1382_vm2, %v1357_v49, 0.0 }
 0x11b   :  { %v856_v27 = vadd.f32 %v2851_v6, %v855_v21  ;;  %v2263_v28 = vpop.f32.mrb[30].mxu0  ;;  %v1599_v7 = vsel %vm1382_vm2, %v1355_v55, 0.0  ;;  %v1162_v16 = vpop.f32.mrb[27].mxu1 }
 0x11c   :  { %v1435_v35 = vadd.f32 %v1434_v60, %v1433_v19  ;;  %v1284_v36 = vmax.f32 %v864_v20, 0.0  ;;  %v867_v37 = vadd.f32 %v2263_v28, %v2851_v6  ;;  %v858_v39 = vpop.f32.mrb[31].mxu0  ;;  %v1600_v15 = vadd.f32 %v1599_v7, %v1598_v53 }
 0x11d   :  { %v1282_v41 = vmax.f32 %v856_v27, 0.0  ;;  %v859_v42 = vadd.f32 %v2851_v6, %v858_v39  ;;  %v1360_v19 = vmax.f32 %v1168_v61, 0.0  ;;  %v1358_v20 = vmax.f32 %v1160_v8, 0.0 }
 0x11e   :  { %v1437_v46 = vadd.f32 %v1436_v34, %v1435_v35  ;;  %v1442_v57 = vsel %vm1382_vm2, %v1284_v36, 0.0  ;;  %v1285_v60 = vmax.f32 %v867_v37, 0.0  ;;  %v1163_v21 = vadd.f32 %v2851_v6, %v1162_v16 }
 0x11f   :  { %v1438_v50 = vsel %vm1382_vm2, %v1282_v41, 0.0  ;;  %v1283_v51 = vmax.f32 %v859_v42, 0.0  ;;  %v1602_v27 = vadd.f32 %v1601_v48, %v1600_v15  ;;  %v1171_v28 = vadd.f32 %v2339_v10, %v2851_v6  ;;  %v2342_v42 = vpop.f32.mrb[28].mxu1 }
 0x120   :  { %v1439_v59 = vadd.f32 %v1438_v50, %v1437_v46  ;;  %v1444_v29 = vsel %vm1382_vm2, %v1285_v60, 0.0  ;;  %v1605_v34 = vsel %vm1382_vm2, %v1358_v20, 0.0  ;;  %v1359_v41 = vmax.f32 %v1163_v21, 0.0  ;;  %v1175_v49 = vpop.f32.mrb[29].mxu1 }
 0x121   :  { %v1440_v2 = vsel %vm1382_vm2, %v1283_v51, 0.0  ;;  %v2266_v3 = vpop.f32.mrb[32].mxu0  ;;  %v1604_v36 = vadd.f32 %v1603_v14, %v1602_v27  ;;  %v1609_v45 = vsel %vm1382_vm2, %v1360_v19, 0.0  ;;  %v1361_v48 = vmax.f32 %v1171_v28, 0.0 }
 0x122   :  { %v1441_v11 = vadd.f32 %v1440_v2, %v1439_v59  ;;  %v880_v12 = vadd.f32 %v2266_v3, %v2851_v6  ;;  %v871_v13 = vpop.f32.mrb[33].mxu0  ;;  %v1607_v55 = vsel %vm1382_vm2, %v1359_v41, 0.0  ;;  %v1176_v56 = vadd.f32 %v2851_v6, %v1175_v49 }
 0x123   :  { %v872_v17 = vadd.f32 %v2851_v6, %v871_v13  ;;  %v2267_v18 = vpop.f32.mrb[34].mxu0  ;;  %v1606_v46 = vadd.f32 %v1605_v34, %v1604_v36  ;;  %v1184_v2 = vadd.f32 %v2342_v42, %v2851_v6  ;;  %v1611_v15 = vsel %vm1382_vm2, %v1361_v48, 0.0 }
 0x124   :  { %v1443_v22 = vadd.f32 %v1442_v57, %v1441_v11  ;;  %v883_v23 = vadd.f32 %v2267_v18, %v2851_v6  ;;  %v874_v25 = vpop.f32.mrb[35].mxu0  ;;  %v1288_v37 = vmax.f32 %v880_v12, 0.0  ;;  %v2343_v57 = vpop.f32.mrb[30].mxu1  ;;  %v1362_v11 = vmax.f32 %v1176_v56, 0.0 }
 0x125   :  { %v1286_v31 = vmax.f32 %v872_v17, 0.0  ;;  %v875_v32 = vadd.f32 %v2851_v6, %v874_v25  ;;  %v1608_v1 = vadd.f32 %v1607_v55, %v1606_v46  ;;  %v1178_v3 = vpop.f32.mrb[31].mxu1 }
 0x126   :  { %v2977_v35 = vadd.f32 %v1444_v29, %v1443_v22  ;;  %v1289_v43 = vmax.f32 %v883_v23, 0.0  ;;  %v1455_v7 = vsel %vm1382_vm2, %v1288_v37, 0.0  ;;  %v1364_v22 = vmax.f32 %v1184_v2, 0.0 }
 0x127   :  { %v1287_v39 = vmax.f32 %v875_v32, 0.0  ;;  %v1452_v50 = vsel %vm1382_vm2, %v1286_v31, 0.0  ;;  %v1610_v19 = vadd.f32 %v1609_v45, %v1608_v1  ;;  %v1187_v23 = vadd.f32 %v2343_v57, %v2851_v6  ;;  %v2346_v31 = vpop.f32.mrb[32].mxu1 }
 0x128   :  { %v1457_v16 = vsel %vm1382_vm2, %v1289_v43, 0.0  ;;  %v1613_v29 = vsel %vm1382_vm2, %v1362_v11, 0.0  ;;  %v1191_v36 = vpop.f32.mrb[33].mxu1  ;;  %v1179_v42 = vadd.f32 %v2851_v6, %v1178_v3  ;;  %v1200_v43 = vadd.f32 %v2346_v31, %v2851_v6 }
 0x129   :  { %v1453_v51 = vsel %vm1382_vm2, %v1287_v39, 0.0  ;;  %v2270_v53 = vpop.f32.mrb[36].mxu0  ;;  %v1612_v28 = vadd.f32 %v1611_v15, %v1610_v19  ;;  %v2347_v45 = vpop.f32.mrb[34].mxu1 }
 0x12a   :  { %v1454_v59 = vadd.f32 %v1453_v51, %v1452_v50  ;;  %v896_v60 = vadd.f32 %v2270_v53, %v2851_v6  ;;  %v887_v61 = vpop.f32.mrb[37].mxu0  ;;  %v1617_v50 = vsel %vm1382_vm2, %v1364_v22, 0.0  ;;  %v1365_v51 = vmax.f32 %v1187_v23, 0.0  ;;  %v1194_v53 = vpop.f32.mrb[35].mxu1 }
 0x12b   :  { %v888_v8 = vadd.f32 %v2851_v6, %v887_v61  ;;  %v2271_v10 = vpop.f32.mrb[38].mxu0  ;;  %v1614_v41 = vadd.f32 %v1613_v29, %v1612_v28 }
 0x12c   :  { %v1456_v12 = vadd.f32 %v1455_v7, %v1454_v59  ;;  %v899_v13 = vadd.f32 %v2271_v10, %v2851_v6  ;;  %v890_v14 = vpop.f32.mrb[39].mxu0  ;;  %v1292_v20 = vmax.f32 %v896_v60, 0.0  ;;  %v1363_v59 = vmax.f32 %v1179_v42, 0.0 }
 0x12d   :  { %v1290_v17 = vmax.f32 %v888_v8, 0.0  ;;  %v891_v18 = vadd.f32 %v2851_v6, %v890_v14  ;;  %v1192_v60 = vadd.f32 %v2851_v6, %v1191_v36  ;;  %v1368_v7 = vmax.f32 %v1200_v43, 0.0 }
 0x12e   :  { %v1458_v21 = vadd.f32 %v1457_v16, %v1456_v12  ;;  %v1293_v34 = vmax.f32 %v899_v13, 0.0  ;;  %v1463_v55 = vsel %vm1382_vm2, %v1292_v20, 0.0  ;;  %v1615_v11 = vsel %vm1382_vm2, %v1363_v59, 0.0 }
 0x12f   :  { %v1459_v25 = vsel %vm1382_vm2, %v1290_v17, 0.0  ;;  %v1291_v27 = vmax.f32 %v891_v18, 0.0  ;;  %v1203_v12 = vadd.f32 %v2347_v45, %v2851_v6  ;;  %v1619_v15 = vsel %vm1382_vm2, %v1365_v51, 0.0 }
 0x130   :  { %v1460_v32 = vadd.f32 %v1459_v25, %v1458_v21  ;;  %v1465_v61 = vsel %vm1382_vm2, %v1293_v34, 0.0  ;;  %v1616_v16 = vadd.f32 %v1615_v11, %v1614_v41  ;;  %v1366_v20 = vmax.f32 %v1192_v60, 0.0  ;;  %v2350_v21 = vpop.f32.mrb[36].mxu1 }
 0x131   :  { %v1461_v37 = vsel %vm1382_vm2, %v1291_v27, 0.0  ;;  %v2274_v39 = vpop.f32.mrb[40].mxu0  ;;  %v1625_v25 = vsel %vm1382_vm2, %v1368_v7, 0.0  ;;  %v1195_v27 = vadd.f32 %v2851_v6, %v1194_v53  ;;  %v1207_v28 = vpop.f32.mrb[37].mxu1  ;;  %v1369_v34 = vmax.f32 %v1203_v12, 0.0 }
 0x132   :  { %v1462_v46 = vadd.f32 %v1461_v37, %v1460_v32  ;;  %v912_v48 = vadd.f32 %v2274_v39, %v2851_v6  ;;  %v903_v49 = vpop.f32.mrb[41].mxu0  ;;  %v1618_v23 = vadd.f32 %v1617_v50, %v1616_v16  ;;  %v1621_v32 = vsel %vm1382_vm2, %v1366_v20, 0.0  ;;  %v2351_v37 = vpop.f32.mrb[38].mxu1 }
 0x133   :  { %v904_v56 = vadd.f32 %v2851_v6, %v903_v49  ;;  %v2275_v57 = vpop.f32.mrb[42].mxu0  ;;  %v1216_v36 = vadd.f32 %v2350_v21, %v2851_v6  ;;  %v1367_v45 = vmax.f32 %v1195_v27, 0.0  ;;  %v1208_v53 = vadd.f32 %v2851_v6, %v1207_v28 }
 0x134   :  { %v1464_v1 = vadd.f32 %v1463_v55, %v1462_v46  ;;  %v915_v2 = vadd.f32 %v2275_v57, %v2851_v6  ;;  %v906_v3 = vpop.f32.mrb[43].mxu0  ;;  %v1296_v13 = vmax.f32 %v912_v48, 0.0  ;;  %v1620_v43 = vadd.f32 %v1619_v15, %v1618_v23  ;;  %v1210_v46 = vpop.f32.mrb[39].mxu1 }
 0x135   :  { %v1294_v8 = vmax.f32 %v904_v56, 0.0  ;;  %v907_v10 = vadd.f32 %v2851_v6, %v906_v3  ;;  %v1372_v60 = vmax.f32 %v1216_v36, 0.0  ;;  %v1623_v3 = vsel %vm1382_vm2, %v1367_v45, 0.0  ;;  %v2354_v16 = vpop.f32.mrb[40].mxu1 }
 0x136   :  { %v1466_v14 = vadd.f32 %v1465_v61, %v1464_v1  ;;  %v1297_v18 = vmax.f32 %v915_v2, 0.0  ;;  %v1471_v48 = vsel %vm1382_vm2, %v1296_v13, 0.0  ;;  %v1622_v59 = vadd.f32 %v1621_v32, %v1620_v43  ;;  %v1223_v21 = vpop.f32.mrb[41].mxu1 }
 0x137   :  { %v1467_v17 = vsel %vm1382_vm2, %v1294_v8, 0.0  ;;  %v1295_v19 = vmax.f32 %v907_v10, 0.0  ;;  %v1627_v8 = vsel %vm1382_vm2, %v1369_v34, 0.0  ;;  %v1219_v11 = vadd.f32 %v2351_v37, %v2851_v6 }
 0x138   :  { %v1468_v22 = vadd.f32 %v1467_v17, %v1466_v14  ;;  %v1473_v49 = vsel %vm1382_vm2, %v1297_v18, 0.0  ;;  %v1624_v10 = vadd.f32 %v1623_v3, %v1622_v59  ;;  %v1370_v15 = vmax.f32 %v1208_v53, 0.0 }
 0x139   :  { %v1469_v29 = vsel %vm1382_vm2, %v1295_v19, 0.0  ;;  %v2278_v31 = vpop.f32.mrb[44].mxu0  ;;  %v1633_v19 = vsel %vm1382_vm2, %v1372_v60, 0.0  ;;  %v1211_v20 = vadd.f32 %v2851_v6, %v1210_v46  ;;  %v1373_v37 = vmax.f32 %v1219_v11, 0.0 }
 0x13a   :  { %v1470_v39 = vadd.f32 %v1469_v29, %v1468_v22  ;;  %v928_v41 = vadd.f32 %v2278_v31, %v2851_v6  ;;  %v919_v42 = vpop.f32.mrb[45].mxu0  ;;  %v1626_v18 = vadd.f32 %v1625_v25, %v1624_v10  ;;  %v1629_v28 = vsel %vm1382_vm2, %v1370_v15, 0.0  ;;  %v2355_v31 = vpop.f32.mrb[42].mxu1 }
 0x13b   :  { %v920_v50 = vadd.f32 %v2851_v6, %v919_v42  ;;  %v2279_v51 = vpop.f32.mrb[46].mxu0  ;;  %v1232_v29 = vadd.f32 %v2354_v16, %v2851_v6  ;;  %v1371_v25 = vmax.f32 %v1211_v20, 0.0  ;;  %v1224_v46 = vadd.f32 %v2851_v6, %v1223_v21 }
 0x13c   :  { %v1472_v55 = vadd.f32 %v1471_v48, %v1470_v39  ;;  %v931_v56 = vadd.f32 %v2279_v51, %v2851_v6  ;;  %v922_v57 = vpop.f32.mrb[47].mxu0  ;;  %v1300_v61 = vmax.f32 %v928_v41, 0.0  ;;  %v1628_v36 = vadd.f32 %v1627_v8, %v1626_v18  ;;  %v1226_v39 = vpop.f32.mrb[43].mxu1 }
 0x13d   :  { %v1298_v1 = vmax.f32 %v920_v50, 0.0  ;;  %v923_v2 = vadd.f32 %v2851_v6, %v922_v57  ;;  %v1376_v53 = vmax.f32 %v1232_v29, 0.0  ;;  %v1631_v57 = vsel %vm1382_vm2, %v1371_v25, 0.0  ;;  %v2358_v10 = vpop.f32.mrb[44].mxu1 }
 0x13e   :  { %v1474_v7 = vadd.f32 %v1473_v49, %v1472_v55  ;;  %v1301_v13 = vmax.f32 %v931_v56, 0.0  ;;  %v1479_v22 = vsel %vm1382_vm2, %v1300_v61, 0.0  ;;  %v1630_v51 = vadd.f32 %v1629_v28, %v1628_v36  ;;  %v1239_v15 = vpop.f32.mrb[45].mxu1 }
 0x13f   :  { %v1475_v12 = vsel %vm1382_vm2, %v1298_v1, 0.0  ;;  %v1299_v14 = vmax.f32 %v923_v2, 0.0  ;;  %v1235_v59 = vadd.f32 %v2355_v31, %v2851_v6  ;;  %v1635_v61 = vsel %vm1382_vm2, %v1373_v37, 0.0 }
 0x140   :  { %v1476_v17 = vadd.f32 %v1475_v12, %v1474_v7  ;;  %v1481_v41 = vsel %vm1382_vm2, %v1301_v13, 0.0  ;;  %v1632_v1 = vadd.f32 %v1631_v57, %v1630_v51  ;;  %v1374_v8 = vmax.f32 %v1224_v46, 0.0 }
 0x141   :  { %v1477_v23 = vsel %vm1382_vm2, %v1299_v14, 0.0  ;;  %v2282_v27 = vpop.f32.mrb[48].mxu0  ;;  %v1227_v14 = vadd.f32 %v2851_v6, %v1226_v39  ;;  %v1641_v18 = vsel %vm1382_vm2, %v1376_v53, 0.0  ;;  %v1377_v21 = vmax.f32 %v1235_v59, 0.0 }
 0x142   :  { %v1478_v32 = vadd.f32 %v1477_v23, %v1476_v17  ;;  %v935_v34 = vpop.f32.mrb[49].mxu0  ;;  %v944_v42 = vadd.f32 %v2282_v27, %v2851_v6  ;;  %v1634_v13 = vadd.f32 %v1633_v19, %v1632_v1  ;;  %v1637_v20 = vsel %vm1382_vm2, %v1374_v8, 0.0 }
 0x143   :  { %v936_v43 = vadd.f32 %v2851_v6, %v935_v34  ;;  %v2283_v45 = vpop.f32.mrb[50].mxu0  ;;  %v1375_v29 = vmax.f32 %v1227_v14, 0.0  ;;  %v1248_v31 = vadd.f32 %v2358_v10, %v2851_v6  ;;  %v1240_v25 = vadd.f32 %v2851_v6, %v1239_v15 }
 0x144   :  { %v1480_v48 = vadd.f32 %v1479_v22, %v1478_v32  ;;  %v947_v49 = vadd.f32 %v2283_v45, %v2851_v6  ;;  %v938_v50 = vpop.f32.mrb[51].mxu0  ;;  %v1304_v2 = vmax.f32 %v944_v42, 0.0  ;;  %v2359_v22 = vpop.f32.mrb[46].mxu1  ;;  %v1636_v28 = vadd.f32 %v1635_v61, %v1634_v13 }
 0x145   :  { %v1302_v55 = vmax.f32 %v936_v43, 0.0  ;;  %v939_v56 = vadd.f32 %v2851_v6, %v938_v50  ;;  %v1242_v32 = vpop.f32.mrb[47].mxu1  ;;  %v1639_v50 = vsel %vm1382_vm2, %v1375_v29, 0.0  ;;  %v1378_v61 = vmax.f32 %v1240_v25, 0.0 }
 0x146   :  { %v1482_v60 = vadd.f32 %v1481_v41, %v1480_v48  ;;  %v1305_v12 = vmax.f32 %v947_v49, 0.0  ;;  %v1487_v19 = vsel %vm1382_vm2, %v1304_v2, 0.0  ;;  %v1638_v45 = vadd.f32 %v1637_v20, %v1636_v28 }
 0x147   :  { %v1483_v3 = vsel %vm1382_vm2, %v1302_v55, 0.0  ;;  %v1303_v7 = vmax.f32 %v939_v56, 0.0  ;;  %v1643_v49 = vsel %vm1382_vm2, %v1377_v21, 0.0  ;;  %v1380_v55 = vmax.f32 %v1248_v31, 0.0 }
 0x148   :  { %v1484_v11 = vadd.f32 %v1483_v3, %v1482_v60  ;;  %v1489_v39 = vsel %vm1382_vm2, %v1305_v12, 0.0  ;;  %v1640_v53 = vadd.f32 %v1639_v50, %v1638_v45  ;;  %v1251_v56 = vadd.f32 %v2359_v22, %v2851_v6 }
 0x149   :  { %v1485_v16 = vsel %vm1382_vm2, %v1303_v7, 0.0  ;;  %v2286_v17 = vpop.f32.mrb[52].mxu0  ;;  %v1243_v7 = vadd.f32 %v2851_v6, %v1242_v32  ;;  %v1649_v28 = vsel %vm1382_vm2, %v1380_v55, 0.0 }
 0x14a   :  { %v1486_v23 = vadd.f32 %v1485_v16, %v1484_v11  ;;  %v951_v27 = vpop.f32.mrb[53].mxu0  ;;  %v960_v34 = vadd.f32 %v2286_v17, %v2851_v6  ;;  %v1642_v3 = vadd.f32 %v1641_v18, %v1640_v53  ;;  %v1645_v11 = vsel %vm1382_vm2, %v1378_v61, 0.0 }
 0x14b   :  { %v952_v36 = vadd.f32 %v2851_v6, %v951_v27  ;;  %v2287_v37 = vpop.f32.mrb[54].mxu0  ;;  %v1379_v15 = vmax.f32 %v1243_v7, 0.0  ;;  %v1381_v22 = vmax.f32 %v1251_v56, 0.0 }
 0x14c   :  { %v1488_v41 = vadd.f32 %v1487_v19, %v1486_v23  ;;  %v963_v42 = vadd.f32 %v2287_v37, %v2851_v6  ;;  %v954_v43 = vpop.f32.mrb[55].mxu0  ;;  %v1308_v57 = vmax.f32 %v960_v34, 0.0  ;;  %v1644_v14 = vadd.f32 %v1643_v49, %v1642_v3 }
 0x14d   :  { %v1306_v46 = vmax.f32 %v952_v36, 0.0  ;;  %v955_v48 = vadd.f32 %v2851_v6, %v954_v43  ;;  %v1647_v34 = vsel %vm1382_vm2, %v1379_v15, 0.0 }
 0x14e   :  { %v1490_v51 = vadd.f32 %v1489_v39, %v1488_v41  ;;  %v1309_v2 = vmax.f32 %v963_v42, 0.0  ;;  %v1495_v16 = vsel %vm1382_vm2, %v1308_v57, 0.0  ;;  %v1646_v29 = vadd.f32 %v1645_v11, %v1644_v14 }
 0x14f   :  { %v1491_v59 = vsel %vm1382_vm2, %v1306_v46, 0.0  ;;  %v1307_v60 = vmax.f32 %v955_v48, 0.0  ;;  %v1651_v42 = vsel %vm1382_vm2, %v1381_v22, 0.0 }
 0x150   :  { %v1492_v1 = vadd.f32 %v1491_v59, %v1490_v51  ;;  %v1497_v18 = vsel %vm1382_vm2, %v1309_v2, 0.0  ;;  %v1648_v37 = vadd.f32 %v1647_v34, %v1646_v29 }
 0x151   :  { %v1493_v8 = vsel %vm1382_vm2, %v1307_v60, 0.0  ;;  %v2290_v10 = vpop.f32.mrb[56].mxu0 }
 0x152   :  { %v1494_v12 = vadd.f32 %v1493_v8, %v1492_v1  ;;  %v967_v13 = vpop.f32.mrb[57].mxu0  ;;  %v976_v17 = vadd.f32 %v2290_v10, %v2851_v6  ;;  %v1650_v45 = vadd.f32 %v1649_v28, %v1648_v37  ;;  %v1446_v8 = vrot.slane %v2977_v35, 4 }
 0x153   :  { %v968_v20 = vadd.f32 %v2851_v6, %v967_v13  ;;  %v2291_v21 = vpop.f32.mrb[58].mxu0 }
 0x154   :  { %v1496_v23 = vadd.f32 %v1495_v16, %v1494_v12  ;;  %v970_v27 = vpop.f32.mrb[59].mxu0  ;;  %v979_v32 = vadd.f32 %v2291_v21, %v2851_v6  ;;  %v1312_v25 = vmax.f32 %v976_v17, 0.0  ;;  %v3072_v53 = vadd.f32 %v1651_v42, %v1650_v45 }
 0x155   :  { %v1310_v31 = vmax.f32 %v968_v20, 0.0  ;;  %v971_v19 = vadd.f32 %v2851_v6, %v970_v27  ;;  %v1447_v20 = vadd.f32 %v1446_v8, %v2977_v35 }
 0x156   :  { %v1498_v36 = vadd.f32 %v1497_v18, %v1496_v23  ;;  %v1313_v46 = vmax.f32 %v979_v32, 0.0  ;;  %v1503_v55 = vsel %vm1382_vm2, %v1312_v25, 0.0 }
 0x157   :  { %v1499_v39 = vsel %vm1382_vm2, %v1310_v31, 0.0  ;;  %v1311_v41 = vmax.f32 %v971_v19, 0.0  ;;  %v1448_v37 = vrot.slane %v1447_v20, 2 }
 0x158   :  { %v1500_v43 = vadd.f32 %v1499_v39, %v1498_v36  ;;  %v1505_v1 = vsel %vm1382_vm2, %v1313_v46, 0.0 }
 0x159   :  { %v1501_v48 = vsel %vm1382_vm2, %v1311_v41, 0.0  ;;  %v2294_v49 = vpop.f32.mrb[60].mxu0 }
 0x15a   :  { %v1502_v50 = vadd.f32 %v1501_v48, %v1500_v43  ;;  %v983_v51 = vpop.f32.mrb[61].mxu0  ;;  %v992_v56 = vadd.f32 %v2294_v49, %v2851_v6  ;;  %v1449_v48 = vadd.f32 %v1448_v37, %v1447_v20 }
 0x15b   :  { %v984_v57 = vadd.f32 %v2851_v6, %v983_v51  ;;  %v2295_v59 = vpop.f32.mrb[62].mxu0 }
 0x15c   :  { %v1504_v60 = vadd.f32 %v1503_v55, %v1502_v50  ;;  %v986_v61 = vpop.f32.mrb[63].mxu0  ;;  %v995_v3 = vadd.f32 %v2295_v59, %v2851_v6  ;;  %v1316_v11 = vmax.f32 %v992_v56, 0.0 }
 0x15d   :  { %v1314_v2 = vmax.f32 %v984_v57, 0.0  ;;  %v987_v7 = vadd.f32 %v2851_v6, %v986_v61 }
 0x15e   :  { %v1506_v10 = vadd.f32 %v1505_v1, %v1504_v60  ;;  %v1317_v15 = vmax.f32 %v995_v3, 0.0  ;;  %v1511_v18 = vsel %vm1382_vm2, %v1316_v11, 0.0 }
 0x15f   :  { %v1507_v12 = vsel %vm1382_vm2, %v1314_v2, 0.0  ;;  %v1315_v13 = vmax.f32 %v987_v7, 0.0 }
 0x160   :  { %v1508_v14 = vadd.f32 %v1507_v12, %v1506_v10  ;;  %v1513_v32 = vsel %vm1382_vm2, %v1317_v15, 0.0  ;;  %v1450_v10 = vrot.slane %v1449_v48, 1 }
 0x161   :  { %v1509_v16 = vsel %vm1382_vm2, %v1315_v13, 0.0  ;;  %v2298_v17 = vpop.f32.mrb[64].mxu0 }
 0x162   :  { %v1510_v21 = vadd.f32 %v1509_v16, %v1508_v14  ;;  %v999_v22 = vpop.f32.mrb[65].mxu0  ;;  %v1008_v23 = vadd.f32 %v2298_v17, %v2851_v6 }
 0x163   :  { %v1000_v27 = vadd.f32 %v2851_v6, %v999_v22  ;;  %v2299_v28 = vpop.f32.mrb[66].mxu0 }
 0x164   :  { %v1512_v29 = vadd.f32 %v1511_v18, %v1510_v21  ;;  %v1002_v31 = vpop.f32.mrb[67].mxu0  ;;  %v1011_v34 = vadd.f32 %v2299_v28, %v2851_v6  ;;  %v1320_v25 = vmax.f32 %v1008_v23, 0.0  ;;  %v1451_v18 = vadd.f32 %v1450_v10, %v1449_v48 }
 0x165   :  { %v1318_v19 = vmax.f32 %v1000_v27, 0.0  ;;  %v1003_v36 = vadd.f32 %v2851_v6, %v1002_v31  ;;  %v3096_v6 = vld [vmem:[%s3260_s2] ss:$0 sm:$0xff] }
 0x166   :  { %v1514_v35 = vadd.f32 %v1513_v32, %v1512_v29  ;;  %v1321_v43 = vmax.f32 %v1011_v34, 0.0  ;;  %v1524_v55 = vsel %vm1382_vm2, %v1320_v25, 0.0 }
 0x167   :  { %v1319_v39 = vmax.f32 %v1003_v36, 0.0  ;;  %v1521_v42 = vsel %vm1382_vm2, %v1318_v19, 0.0 }
 0x168   :  { %v1515_v41 = vrot.slane %v1514_v35, 4  ;;  %v1526_v2 = vsel %vm1382_vm2, %v1321_v43, 0.0 }
 0x169   :  { %v1522_v45 = vsel %vm1382_vm2, %v1319_v39, 0.0  ;;  %v2302_v46 = vpop.f32.mrb[68].mxu0 }
 0x16a   :  { %v1516_v49 = vadd.f32 %v1515_v41, %v1514_v35  ;;  %v1523_v50 = vadd.f32 %v1522_v45, %v1521_v42  ;;  %v1015_v51 = vpop.f32.mrb[69].mxu0  ;;  %v1024_v56 = vadd.f32 %v3096_v6, %v2302_v46 }
 0x16b   :  { %v1016_v57 = vadd.f32 %v3096_v6, %v1015_v51  ;;  %v2303_v59 = vpop.f32.mrb[70].mxu0 }
 0x16c   :  { %v1517_v60 = vrot.slane %v1516_v49, 2  ;;  %v1525_v61 = vadd.f32 %v1524_v55, %v1523_v50  ;;  %v1018_v1 = vpop.f32.mrb[71].mxu0  ;;  %v1027_v7 = vadd.f32 %v3096_v6, %v2303_v59  ;;  %v1324_v13 = vmax.f32 %v1024_v56, 0.0 }
 0x16d   :  { %v1322_v3 = vmax.f32 %v1016_v57, 0.0  ;;  %v1019_v8 = vadd.f32 %v3096_v6, %v1018_v1 }
 0x16e   :  { %v1518_v11 = vadd.f32 %v1517_v60, %v1516_v49  ;;  %v1527_v12 = vadd.f32 %v1526_v2, %v1525_v61  ;;  %v1325_v20 = vmax.f32 %v1027_v7, 0.0  ;;  %v1532_v29 = vsel %vm1382_vm2, %v1324_v13, 0.0 }
 0x16f   :  { %v1528_v14 = vsel %vm1382_vm2, %v1322_v3, 0.0  ;;  %v1323_v15 = vmax.f32 %v1019_v8, 0.0 }
 0x170   :  { %v1519_v16 = vrot.slane %v1518_v11, 1  ;;  %v1529_v17 = vadd.f32 %v1528_v14, %v1527_v12  ;;  %v1534_v35 = vsel %vm1382_vm2, %v1325_v20, 0.0  ;;  %v1064_v12 = vadd.f32 %v3096_v6, %v2869_v40 }
 0x171   :  { %v1530_v21 = vsel %vm1382_vm2, %v1323_v15, 0.0  ;;  %v2306_v22 = vpop.f32.mrb[72].mxu0  ;;  %v1075_v40 = vadd.f32 %v3096_v6, %v2872_v44 }
 0x172   :  { %v1520_v23 = vadd.f32 %v1519_v16, %v1518_v11  ;;  %v1531_v27 = vadd.f32 %v1530_v21, %v1529_v17  ;;  %v1031_v28 = vpop.f32.mrb[73].mxu0  ;;  %v1040_v31 = vadd.f32 %v3096_v6, %v2306_v22  ;;  %v1067_v17 = vadd.f32 %v3096_v6, %v2874_v47 }
 0x173   :  { %v1032_v32 = vadd.f32 %v3096_v6, %v1031_v28  ;;  %v2307_v19 = vpop.f32.mrb[74].mxu0 }
 0x174   :  { %v1533_v34 = vadd.f32 %v1532_v29, %v1531_v27  ;;  %v1034_v36 = vpop.f32.mrb[75].mxu0  ;;  %v3109_v37 = vsel %vm1659_vm4, %v1451_v18, %v1520_v23  ;;  %v1043_v39 = vadd.f32 %v3096_v6, %v2307_v19  ;;  %v1328_v43 = vmax.f32 %v1040_v31, 0.0 }
 0x175   :  { %v1326_v25 = vmax.f32 %v1032_v32, 0.0  ;;  %v1035_v41 = vadd.f32 %v3096_v6, %v1034_v36  ;;  %v1072_v18 = vadd.f32 %v3096_v6, %v2867_v38  ;;  %v1334_v23 = vmax.f32 %v1064_v12, 0.0 }
 0x176   :  { %v1535_v42 = vadd.f32 %v1534_v35, %v1533_v34  ;;  %v1329_v49 = vmax.f32 %v1043_v39, 0.0  ;;  %v1540_v57 = vsel %vm1382_vm2, %v1328_v43, 0.0  ;;  %v1335_v29 = vmax.f32 %v1067_v17, 0.0 }
 0x177   :  { %v1536_v45 = vsel %vm1382_vm2, %v1326_v25, 0.0  ;;  %v1327_v46 = vmax.f32 %v1035_v41, 0.0  ;;  %v1336_v19 = vmax.f32 %v1072_v18, 0.0  ;;  %v1552_v47 = vsel %vm1382_vm2, %v1334_v23, 0.0 }
 0x178   :  { %v1537_v48 = vadd.f32 %v1536_v45, %v1535_v42  ;;  %v1542_v3 = vsel %vm1382_vm2, %v1329_v49, 0.0  ;;  %v1080_v34 = vadd.f32 %v3096_v6, %v2885_v0  ;;  %v1337_v35 = vmax.f32 %v1075_v40, 0.0 }
 0x179   :  { %v1538_v50 = vsel %vm1382_vm2, %v1327_v46, 0.0  ;;  %v2310_v51 = vpop.f32.mrb[76].mxu0  ;;  %v1554_v38 = vsel %vm1382_vm2, %v1335_v29, 0.0  ;;  %v1083_v25 = vadd.f32 %v3096_v6, %v2890_v9  ;;  %v1556_v44 = vsel %vm1382_vm2, %v1336_v19, 0.0 }
 0x17a   :  { %v1539_v55 = vadd.f32 %v1538_v50, %v1537_v48  ;;  %v1047_v56 = vpop.f32.mrb[77].mxu0  ;;  %v1056_v59 = vadd.f32 %v3096_v6, %v2310_v51  ;;  %v1088_v41 = vadd.f32 %v3096_v6, %v2883_v62  ;;  %v1338_v42 = vmax.f32 %v1080_v34, 0.0 }
 0x17b   :  { %v1048_v60 = vadd.f32 %v3096_v6, %v1047_v56  ;;  %v2311_v61 = vpop.f32.mrb[78].mxu0  ;;  %v1558_v45 = vsel %vm1382_vm2, %v1337_v35, 0.0  ;;  %v1091_v0 = vadd.f32 %v3096_v6, %v2888_v5  ;;  %v1339_v46 = vmax.f32 %v1083_v25, 0.0 }
 0x17c   :  { %v1541_v1 = vadd.f32 %v1540_v57, %v1539_v55  ;;  %v1050_v2 = vpop.f32.mrb[79].mxu0  ;;  %v1059_v8 = vadd.f32 %v3096_v6, %v2311_v61  ;;  %v1332_v13 = vmax.f32 %v1056_v59, 0.0  ;;  %v1340_v49 = vmax.f32 %v1088_v41, 0.0 }
 0x17d   :  { %v1330_v7 = vmax.f32 %v1048_v60, 0.0  ;;  %v1051_v10 = vadd.f32 %v3096_v6, %v1050_v2  ;;  %v1560_v50 = vsel %vm1382_vm2, %v1338_v42, 0.0  ;;  %v1096_v9 = vadd.f32 %v3096_v6, %v2901_v26  ;;  %v2483_v42 = vld [vmem:[%s3261_s3] sm:$0xff]  }
 0x17e   :  { %v1543_v11 = vadd.f32 %v1542_v3, %v1541_v1  ;;  %v1333_v20 = vmax.f32 %v1059_v8, 0.0  ;;  %v1548_v27 = vsel %vm1382_vm2, %v1332_v13, 0.0  ;;  %v1341_v55 = vmax.f32 %v1091_v0, 0.0  ;;  %v2484_v0 = vld [vmem:[%s3264_s6] sm:$0xff]  }
 0x17f   :  { %v1544_v14 = vsel %vm1382_vm2, %v1330_v7, 0.0  ;;  %v1331_v15 = vmax.f32 %v1051_v10, 0.0  ;;  %v1562_v56 = vsel %vm1382_vm2, %v1339_v46, 0.0  ;;  %v1099_v62 = vadd.f32 %v3096_v6, %v2906_v33 }
 0x180   :  { %v1545_v16 = vadd.f32 %v1544_v14, %v1543_v11  ;;  %v1550_v31 = vsel %vm1382_vm2, %v1333_v20, 0.0  ;;  %v1564_v59 = vsel %vm1382_vm2, %v1340_v49, 0.0  ;;  %v1104_v5 = vadd.f32 %v3096_v6, %v2899_v24  ;;  %v2487_v49 = vld [vmem:[%s3264_s6 + $0x18] sm:$0xff]  }
 0x181   :  { %v1546_v21 = vsel %vm1382_vm2, %v1331_v15, 0.0  ;;  %v1342_v60 = vmax.f32 %v1096_v9, 0.0  ;;  %v1566_v1 = vsel %vm1382_vm2, %v1341_v55, 0.0  ;;  %v1107_v26 = vadd.f32 %v3096_v6, %v2904_v30  ;;  %v2489_v9 = vld [vmem:[%s3264_s6 + $0x28] sm:$0xff]   ;;  %v2491_v55 = vld [vmem:[%s3264_s6 + $0x38] sm:$0xff]  }
 0x182   :  { %v1547_v22 = vadd.f32 %v1546_v21, %v1545_v16  ;;  %v1343_v2 = vmax.f32 %v1099_v62, 0.0  ;;  %v1344_v7 = vmax.f32 %v1104_v5, 0.0  ;;  %v1112_v33 = vadd.f32 %v3096_v6, %v2917_v54 }
 0x183   :  { %v1568_v8 = vsel %vm1382_vm2, %v1342_v60, 0.0  ;;  %v1345_v11 = vmax.f32 %v1107_v26, 0.0  ;;  %v1115_v24 = vadd.f32 %v3096_v6, %v2923_v63  ;;  %v1120_v30 = vadd.f32 %v3096_v6, %v2915_v52  ;;  %v2125_v60 = vld [vmem:[%s3263_s5] ss:$0 sm:$0xff] }
 0x184   :  { %v1549_v28 = vadd.f32 %v1548_v27, %v1547_v22  ;;  %v1570_v12 = vsel %vm1382_vm2, %v1343_v2, 0.0  ;;  %v1572_v14 = vsel %vm1382_vm2, %v1344_v7, 0.0  ;;  %v1346_v15 = vmax.f32 %v1112_v33, 0.0 }
 0x185   :  { %v1574_v17 = vsel %vm1382_vm2, %v1345_v11, 0.0  ;;  %v1123_v54 = vadd.f32 %v3096_v6, %v2920_v58  ;;  %v1347_v20 = vmax.f32 %v1115_v24, 0.0  ;;  %v1653_v22 = vrot.slane %v3072_v53, 4  ;;  %v2494_v11 = vld [vmem:[%s3266_s8 + $0x10] sm:$0xff]   ;;  %v2126_v24 = vld [vmem:[%s3265_s7] ss:$0 sm:$0xff] }
 0x186   :  { %v1551_v32 = vadd.f32 %v1550_v31, %v1549_v28  ;;  %v1348_v18 = vmax.f32 %v1120_v30, 0.0  ;;  %v1576_v63 = vsel %vm1382_vm2, %v1346_v15, 0.0 }
 0x187   :  { %v1349_v27 = vmax.f32 %v1123_v54, 0.0  ;;  %v1578_v28 = vsel %vm1382_vm2, %v1347_v20, 0.0  ;;  %v1654_v52 = vadd.f32 %v1653_v22, %v3072_v53 }
 0x188   :  { %v1553_v36 = vadd.f32 %v1552_v47, %v1551_v32  ;;  %v1580_v29 = vsel %vm1382_vm2, %v1348_v18, 0.0 }
 0x189   :  { %v1582_v32 = vsel %vm1382_vm2, %v1349_v27, 0.0  ;;  %v1655_v58 = vrot.slane %v1654_v52, 2 }
 0x18a   :  { %v1555_v39 = vadd.f32 %v1554_v38, %v1553_v36 }
 0x18b   :  { %v1656_v47 = vadd.f32 %v1655_v58, %v1654_v52 }
 0x18c   :  { %v1557_v43 = vadd.f32 %v1556_v44, %v1555_v39 }
 0x18d   :  { %v1657_v35 = vrot.slane %v1656_v47, 1 }
 0x18e   :  { %v1559_v48 = vadd.f32 %v1558_v45, %v1557_v43  ;;  %v1661_v45 = vmul.f32 0.00390625, %v3109_v37  ;;  %v2486_v37 = vld [vmem:[%s3264_s6 + $0x10] sm:$0xff]  }
 0x18f   :  { %v1658_v39 = vadd.f32 %v1657_v35, %v1656_v47 }
 0x190   :  { %v1561_v51 = vadd.f32 %v1560_v50, %v1559_v48  ;;  %v1662_v46 = vpack.c.bf16 %v1661_v45, %v1661_v45  ;;  %v2485_v48 = vld [vmem:[%s3264_s6 + $0x8] sm:$0xff]   ;;  %v2488_v50 = vld [vmem:[%s3264_s6 + $0x20] sm:$0xff]  }
 0x192   :  { %v1563_v57 = vadd.f32 %v1562_v56, %v1561_v51  ;;  %v2490_v51 = vld [vmem:[%s3264_s6 + $0x30] sm:$0xff]  }
 0x194   :  { %v1565_v61 = vadd.f32 %v1564_v59, %v1563_v57 }
 0x196   :  { %v1567_v3 = vadd.f32 %v1566_v1, %v1565_v61 }
 0x198   :  { %v1569_v10 = vadd.f32 %v1568_v8, %v1567_v3  ;;  %v2492_v8 = vld [vmem:[%s3266_s8] sm:$0xff]  }
 0x19a   :  { %v1571_v13 = vadd.f32 %v1570_v12, %v1569_v10  ;;  %v2493_v10 = vld [vmem:[%s3266_s8 + $0x8] sm:$0xff]   ;;  %v2495_v12 = vld [vmem:[%s3266_s8 + $0x18] sm:$0xff]   ;;  %s1981_s8 = sshll.u32 %s2523_s27, 4  ;;  %s1982_s8 = int_to_ptr.vmem [resolvable:$true] %s1981_s8 }
 0x19b   :  { %s2497_s7 = scalar_lea.vmem %s1982_s8, 32  ;;  %p2502_p1 = scmp.lt.s32.totalorder %s1982_s8, %s1982_s8 }
 0x19c   :  { %v1573_v16 = vadd.f32 %v1572_v14, %v1571_v13  ;;  %p2498_p0 = scmp.ne.s32.totalorder %s1982_s8, %s2497_s7  ;;  %p2503_p2 = scmp.lt.s32.totalorder %s2497_s7, %s2497_s7 }
 0x19e   :  { %v1575_v21 = vadd.f32 %v1574_v17, %v1573_v16  ;;  %p2504_p3 = por %p2503_p2, %p2502_p1 }
 0x1a0   :  { %v1577_v23 = vadd.f32 %v1576_v63, %v1575_v21  ;;  %p2505_p4 = pnand %p2504_p3, %p2498_p0 }
 0x1a2   :  { %v1579_v40 = vadd.f32 %v1578_v28, %v1577_v23 }
 0x1a4   :  { %v1581_v31 = vadd.f32 %v1580_v29, %v1579_v40 }
 0x1a6   :  { %v1583_v6 = vadd.f32 %v1582_v32, %v1581_v31 }
 0x1a8   :  { %v1584_v19 = vrot.slane %v1583_v6, 4 }
 0x1aa   :  { %v1585_v34 = vadd.f32 %v1584_v19, %v1583_v6 }
 0x1ac   :  { %v1586_v36 = vrot.slane %v1585_v34, 2 }
 0x1ae   :  { %v1587_v38 = vadd.f32 %v1586_v36, %v1585_v34 }
 0x1b0   :  { %v1588_v25 = vrot.slane %v1587_v38, 1 }
 0x1b2   :  { %v1589_v44 = vadd.f32 %v1588_v25, %v1587_v38 }
 0x1b4   :  { %v1663_v41 = vsel %vm1659_vm4, %v1589_v44, %v1658_v39 }
 0x1b5   :  { %v1664_v53 = vmul.f32 0.00390625, %v1663_v41 }
 0x1b7   :  { %v1665_v43 = vpack.c.bf16 %v1664_v53, %v1664_v53 }
 0x1b9   :  { %2363 = vmatmul.mubr.msk.bf16.vlgmr.msra.gmra.mrb[48].mxu1 %vm1382_vm2, %v1665_v43 }
 0x1ba   :  { %2367 = vmatpush3.bf16.msra.mxu1 %v2483_v42  ;;  %2368 = vmatprep.mubr.msk.bf16.mxu1 %vm2522_vm3, %v2521_v4 }
 0x1bb   :  { %2372 = vmatprep.subr.bf16.mxu1 %v2521_v4 }
 0x1c1   :  { %2369 = vmatmul.mubr.msk.bf16.vlgmr.msra.gmra.mrb[52].mxu1 %vm1382_vm2, %v1662_v46 }
 0x1c2   :  { %2373 = vmatpush3.bf16.msra.mxu1 %v2484_v0  ;;  %2388 = vmatprep.mubr.msk.bf16.mxu1 %vm2522_vm3, %v2521_v4 }
 0x1c3   :  { %2374 = vmatprep.subr.bf16.mxu1 %v2521_v4 }
 0x1c6   :  { %2375 = vmatpush3.bf16.msra.mxu1 %v2485_v48 }
 0x1c7   :  { %2376 = vmatprep.subr.bf16.mxu1 %v2521_v4 }
 0x1ca   :  { %2377 = vmatpush3.bf16.msra.mxu1 %v2486_v37 }
 0x1cb   :  { %2378 = vmatprep.subr.bf16.mxu1 %v2521_v4 }
 0x1ce   :  { %2379 = vmatpush3.bf16.msra.mxu1 %v2487_v49 }
 0x1cf   :  { %2380 = vmatprep.subr.bf16.mxu1 %v2521_v4 }
 0x1d2   :  { %2381 = vmatpush3.bf16.msra.mxu1 %v2488_v50 }
 0x1d3   :  { %2382 = vmatprep.subr.bf16.mxu1 %v2521_v4 }
 0x1d6   :  { %2383 = vmatpush3.bf16.msra.mxu1 %v2489_v9 }
 0x1d7   :  { %2384 = vmatprep.subr.bf16.mxu1 %v2521_v4 }
 0x1da   :  { %2385 = vmatpush3.bf16.msra.mxu1 %v2490_v51 }
 0x1db   :  { %2386 = vmatprep.subr.bf16.mxu1 %v2521_v4 }
 0x1de   :  { %2387 = vmatpush3.bf16.msra.mxu1 %v2491_v55 }
 0x1df   :  { %2392 = vmatprep.subr.bf16.mxu1 %v2521_v4 }
 0x28c   :  { %v1713_v56 = vpop.f32.mrb[48].mxu1 }
 0x28d   :  { %v2364_v62 = vpop.f32.mrb[49].mxu1 }
 0x28e   :  { %v1716_v57 = vpop.f32.mrb[50].mxu1 }
 0x28f   :  { %v2365_v59 = vpop.f32.mrb[51].mxu1 }
 0x294   :  { %v1762_v5 = vpop.f32.mrb[52].mxu1 }
 0x295   :  { %v1763_v61 = vadd.f32 %v1762_v5, %v1713_v56  ;;  %v2370_v1 = vpop.f32.mrb[53].mxu1 }
 0x296   :  { %v1765_v26 = vpop.f32.mrb[54].mxu1 }
 0x297   :  { %v1775_v2 = vadd.f32 %v2125_v60, %v1763_v61  ;;  %v2371_v3 = vpop.f32.mrb[55].mxu1 }
 0x299   :  { %v1776_v7 = vmax.f32 %v1775_v2, 0.0 }
 0x29b   :  { %v1777_v33 = vpack.c.bf16 %v1776_v7, %v1776_v7 }
 0x29d   :  { %2389 = vmatmul.mubr.bf16.vlgmr.msra.gmra.mrb[56].mxu1 %v1777_v33 }
 0x29e   :  { %2393 = vmatpush3.bf16.msra.mxu1 %v2492_v8  ;;  %2400 = vmatprep.mubr.msk.bf16.mxu1 %vm2522_vm3, %v2521_v4 }
 0x29f   :  { %2394 = vmatprep.subr.bf16.mxu1 %v2521_v4 }
 0x2a2   :  { %2395 = vmatpush3.bf16.msra.mxu1 %v2493_v10 }
 0x2a3   :  { %2396 = vmatprep.subr.bf16.mxu1 %v2521_v4 }
 0x2a6   :  { %2397 = vmatpush3.bf16.msra.mxu1 %v2494_v11 }
 0x2a7   :  { %2398 = vmatprep.subr.bf16.mxu1 %v2521_v4  ;;  %v2135_v4 = vld [vmem:[%s3267_s9] ss:$0 sm:$0xff] }
 0x2aa   :  { %2399 = vmatpush3.bf16.msra.mxu1 %v2495_v12 }
 0x370   :  { %v1883_v13 = vpop.f32.mrb[56].mxu1 }
 0x371   :  { %v1884_v14 = vadd.f32 %v2126_v24, %v1883_v13  ;;  %v2390_v30 = vpop.f32.mrb[57].mxu1 }
 0x372   :  { %v1886_v15 = vpop.f32.mrb[58].mxu1 }
 0x373   :  { %v1889_v16 = vmax.f32 %v1884_v14, 0.0  ;;  %v2391_v17 = vpop.f32.mrb[59].mxu1 }
 0x375   :  { %v1890_v54 = vpack.c.bf16 %v1889_v16, %v1889_v16 }
 0x377   :  { %2401 = vmatmul.mubr.msk.bf16.vlgmr.msra.gmra.mrb[60].mxu1 %vm1930_vm5, %v1890_v54 }
 0x44a   :  { %v1968_v20 = vpop.f32.mrb[60].mxu1 }
 0x44b   :  { %v1969_v21 = vadd.f32 %v2135_v4, %v1968_v20  ;;  %v2402_v22 = vpop.f32.mrb[61].mxu1 }
 0x44c   :  { %v1971_v18 = vpop.f32.mrb[62].mxu1 }
 0x44d   :  { %1974 = vst [vmem:[#allocation2] sm:$0x3] %v1969_v21  ;;  %v2403_v63 = vpop.f32.mrb[63].mxu1 }
 0x44e   :  { %2508 = shalt.err (!%p2505_p4)
}
 0x44f   :  { %s2509_s9 = scalar_lea.hbm %s3268_s10, 32 }
 0x450   :  { %p2510_p5 = scmp.ne.s32.totalorder %s3268_s10, %s2509_s9  ;;  %p2513_p6 = scmp.lt.u32.totalorder %s2509_s9, %s3268_s10 }
 0x452   :  { %p2515_p7 = pnand %p2513_p6, %p2510_p5 }
 0x454   :  { %2518 = shalt.err (!%p2515_p7)
}
 0x455   :  { %1984 = dma.vmem_to_hbm [thread:$0]  %s1982_s8, 32, %s3268_s10, [#allocation3]  }
 0x456   :  { %2519 = dma.done.wait [#allocation3], 32  }
 0x457   :  { %2520 = vsyncadd [#allocation3], 4294967264 }
 0x458   :  { %1988 = vsyncpa [#allocation3], 1 }

</bundles_post_ra>
